<compile_context>
chip_gen: v6e
topology: v6e:2x2x1
jax: 0.10.0
libtpu: 0.0.40
codegen_flags: <defaults>
</compile_context>

<pallas_src>
import jax
import jax.numpy as jnp
from jax.experimental import pallas as pl
from jax.experimental.pallas import tpu as pltpu

EPS = 1e-5
LANE = 128
DEFAULT_BATCH_TILE = 1024


def _round_up(x, m):
    return (x + m - 1) // m * m


def _vmem_budget_bytes():
    """Generation-aware VMEM budget for the fused path (also used as the
    explicit vmem_limit_bytes)."""
    try:
        cap = int(getattr(pltpu.get_tpu_info(), "vmem_capacity_bytes", 0) or 0)
    except Exception:
        cap = 0
    if cap <= 0:
        cap = 64 << 20          # conservative fallback: v7x per-TC VMEM
    # Half the reported capacity, clamped so we stay well inside the smallest
    # physical VMEM (v7x: 64 MiB/TC) even if capacity is reported per-chip.
    return min(max(cap // 2, 16 << 20), 48 << 20)


def _fused_bytes_estimate(params, batch):
    """Conservative live-set estimate for the fused kernel: all f32 layer
    outputs + the bf16 dot-LHS casts assumed simultaneously live, + weights."""
    per_row = 4 * params[0]["in_dim"]                   # f32 input
    weights = 0
    for l in params:
        per_row += 4 * l["p_out"]                       # f32 layer output
        per_row += 2 * l["w"].shape[0]                  # bf16 cast of dot LHS
        vec = l["gamma_beta"] if l["bn"] else l["b"]
        weights += l["w"].size * 2 + vec.size * 4
    return weights + per_row * batch


# ----------------------------------------------------------------------------
# Parameters
# ----------------------------------------------------------------------------
def init_autoencoder_params(key, input_dim, encoder_hidden_sizes, latent_dim):
    """Parameters matching the PyTorch module, stored padded & MXU-ready.

    Linear weights: torch default U(-1/sqrt(fan_in), 1/sqrt(fan_in)), stored
    pre-transposed as (in, out) in bf16.  The out dim is zero-padded to a
    multiple of 128 lanes; the in dim is padded too EXCEPT for the first layer
    (its input x is passed unpadded).  Biases / BN gamma, beta: f32, padded
    with zeros (gamma padded with 0 so padded lanes stay identically zero
    through the whole network).
    """
    enc_sizes = [input_dim] + list(encoder_hidden_sizes) + [latent_dim]
    dec_hidden = list(reversed(list(encoder_hidden_sizes)))
    dec_sizes = [latent_dim] + dec_hidden + [input_dim]

    layer_dims = list(zip(enc_sizes[:-1], enc_sizes[1:])) + \
                 list(zip(dec_sizes[:-1], dec_sizes[1:]))
    n_enc, n_dec = len(enc_sizes) - 1, len(dec_sizes) - 1
    # Hidden layers (all but the last Linear of each MLP) get BN + tanh.
    has_bn_act = [i != n_enc - 1 for i in range(n_enc)] + \
                 [i != n_dec - 1 for i in range(n_dec)]

    params = []
    for li, ((fan_in, fan_out), bn) in enumerate(zip(layer_dims, has_bn_act)):
        key, kw, kb = jax.random.split(key, 3)
        bound = 1.0 / (fan_in ** 0.5)
        w = jax.random.uniform(kw, (fan_in, fan_out), jnp.float32, -bound, bound)
        b = jax.random.uniform(kb, (1, fan_out), jnp.float32, -bound, bound)
        p_in = fan_in if li == 0 else _round_up(fan_in, LANE)
        p_out = _round_up(fan_out, LANE)
        w_pad = jnp.zeros((p_in, p_out), jnp.float32)
        w_pad = w_pad.at[:fan_in, :fan_out].set(w).astype(jnp.bfloat16)
        b_pad = jnp.zeros((1, p_out), jnp.float32).at[:, :fan_out].set(b)
        layer = dict(w=w_pad, b=b_pad, bn=bn, in_dim=fan_in, out_dim=fan_out,
                     p_in=p_in, p_out=p_out)
        if bn:
            gamma = jnp.zeros((1, p_out), jnp.float32).at[:, :fan_out].set(1.0)
            beta = jnp.zeros((1, p_out), jnp.float32)
            layer["gamma_beta"] = jnp.concatenate([gamma, beta], axis=0)  # (2,P)
        params.append(layer)
    return params, has_bn_act


# ----------------------------------------------------------------------------
# Kernels
# ----------------------------------------------------------------------------
def _make_fused_kernel(layer_is_bn, batch):
    """Whole forward in one call, full batch VMEM-resident.

    Ref order: x, then per layer (W, vec) where vec = packed (gamma, beta) for
    BN layers or the bias for plain layers, then out.
    """
    layer_is_bn = tuple(layer_is_bn)
    inv_n = 1.0 / float(batch)

    def kernel(*refs):
        x = refs[0][...].astype(jnp.float32)                # (B, in_dim)
        idx = 1
        for is_bn in layer_is_bn:
            w = refs[idx][...]                              # (K, P_out) bf16
            vec = refs[idx + 1][...]                        # (2|1, P_out) f32
            idx += 2
            y = jnp.dot(x.astype(jnp.bfloat16), w,
                        preferred_element_type=jnp.float32)  # MXU, f32 acc
            if is_bn:
                # Training-mode BatchNorm1d folded to one scale/shift (+ tanh),
                # one-pass moments.  The Linear bias of BN layers is dropped
                # (mathematically cancelled by the mean subtraction).
                s1 = jnp.sum(y, axis=0, keepdims=True)
                s2 = jnp.sum(y * y, axis=0, keepdims=True)
                mean = s1 * inv_n
                var = jnp.maximum(s2 * inv_n - mean * mean, 0.0)
                scale = vec[0:1, :] * jax.lax.rsqrt(var + EPS)   # gamma*rsqrt
                shift = vec[1:2, :] - mean * scale               # beta - mean*scale
                y = jnp.tanh(y * scale + shift)                  # f32 math (v5e-safe)
            else:
                y = y + vec                                 # plain Linear bias
            x = y
        refs[idx][...] = x

    return kernel


def _make_stage_kernel(apply_in_affine, linear_has_bias, emit_stats, *,
                       batch_tile, real_batch, mask_rows, out_dtype):
    """One batch-tile stage of the two-pass (batch-tiled) pipeline.

    Ref order:
      x, [stats (n_tiles,2,P_in), gamma_beta (2,P_in)],
      per Linear (W [, bias]), out, [stats_out (1,2,P_out)].

    If the previous stage ended with a BN layer, the full-batch scale/shift is
    recomputed here from the per-tile stats (no inter-stage XLA reduction) and
    tanh(x*scale+shift) is applied; then a chain of Linears; if this stage
    ends with a BN layer it emits this tile's (sum, sum_sq) so the next stage
    can form FULL-batch statistics.  Padded rows are masked out of the stats.
    """
    linear_has_bias = tuple(linear_has_bias)
    inv_n = 1.0 / float(real_batch)

    def kernel(*refs):
        idx = 0
        x = refs[idx][...].astype(jnp.float32)              # (TB, P_in)
        idx += 1
        if apply_in_affine:
            stats = refs[idx][...]                          # (n_tiles, 2, P_in) f32
            gb = refs[idx + 1][...]                         # (2, P_in) f32
            idx += 2
            tot = jnp.sum(stats, axis=0)                    # (2, P_in)
            mean = tot[0:1, :] * inv_n
            var = jnp.maximum(tot[1:2, :] * inv_n - mean * mean, 0.0)
            scale = gb[0:1, :] * jax.lax.rsqrt(var + EPS)
            shift = gb[1:2, :] - mean * scale
            x = jnp.tanh(x * scale + shift)                 # f32 math (v5e-safe)
        for has_bias in linear_has_bias:
            w = refs[idx][...]                              # (K, P_out) bf16
            idx += 1
            y = jnp.dot(x.astype(jnp.bfloat16), w,
                        preferred_element_type=jnp.float32)
            if has_bias:
                y = y + refs[idx][...]
                idx += 1
            x = y
        out_ref = refs[idx]
        idx += 1
        out_ref[...] = x.astype(out_dtype)                  # bf16 inter-stage
        if emit_stats:
            stats_ref = refs[idx]                           # block (1, 2, P_out)
            if mask_rows:
                row = (jax.lax.broadcasted_iota(jnp.int32, (batch_tile, 1), 0)
                       + pl.program_id(0) * batch_tile)
                xv = jnp.where(row < real_batch, x, 0.0)
            else:
                xv = x
            stats_ref[0, 0:1, :] = jnp.sum(xv, axis=0, keepdims=True)
            stats_ref[0, 1:2, :] = jnp.sum(xv * xv, axis=0, keepdims=True)

    return kernel


# ----------------------------------------------------------------------------
# Forward wrappers
# ----------------------------------------------------------------------------
def _forward_fused(x, params, vmem_limit):
    vmem = pltpu.MemorySpace.VMEM
    inputs = [x]
    for l in params:
        inputs.append(l["w"])
        inputs.append(l["gamma_beta"] if l["bn"] else l["b"])
    kernel = _make_fused_kernel([l["bn"] for l in params], x.shape[0])
    out_shape = jax.ShapeDtypeStruct((x.shape[0], params[-1]["p_out"]),
                                     jnp.float32)
    return pl.pallas_call(
        kernel,
        out_shape=out_shape,
        in_specs=[pl.BlockSpec(memory_space=vmem)] * len(inputs),
        out_specs=pl.BlockSpec(memory_space=vmem),
        compiler_params=pltpu.CompilerParams(vmem_limit_bytes=vmem_limit),
    )(*inputs)


def _forward_staged(x, params, batch_tile, vmem_limit):
    assert not params[-1]["bn"], "LNMLP always ends with a plain Linear"
    batch = x.shape[0]
    tb = batch_tile

    padded = _round_up(batch, tb)
    n_tiles = padded // tb
    if n_tiles > 1 and n_tiles % 2 == 1:
        n_tiles += 1                      # keep both v7x TensorCores busy
        padded = n_tiles * tb
    if padded != batch:
        x = jnp.pad(x, ((0, padded - batch), (0, 0)))
    mask_rows = padded != batch

    cparams = pltpu.CompilerParams(
        dimension_semantics=("parallel",),   # independent batch tiles
        vmem_limit_bytes=vmem_limit)

    # Group layers into stages: zero or more plain Linears ending either with a
    # single BN Linear (stats barrier) or with the end of the network.
    stages, cur = [], []
    for layer in params:
        cur.append(layer)
        if layer["bn"]:
            stages.append(cur)
            cur = []
    if cur:
        stages.append(cur)

    a = x
    pending_bn = None     # (per-tile stats array, gamma_beta) awaiting application
    for si, stage in enumerate(stages):
        emit_stats = stage[-1]["bn"]
        is_last = si == len(stages) - 1
        apply_in = pending_bn is not None
        linear_has_bias = tuple(not l["bn"] for l in stage)
        out_dtype = jnp.float32 if is_last else jnp.bfloat16

        kernel = _make_stage_kernel(
            apply_in, linear_has_bias, emit_stats,
            batch_tile=tb, real_batch=batch, mask_rows=mask_rows,
            out_dtype=out_dtype)

        inputs = [a]
        in_specs = [pl.BlockSpec((tb, a.shape[1]), lambda i: (i, 0))]
        if apply_in:
            stats_prev, gb_prev = pending_bn
            inputs += [stats_prev, gb_prev]
            in_specs += [pl.BlockSpec(stats_prev.shape, lambda i: (0, 0, 0)),
                         pl.BlockSpec(gb_prev.shape, lambda i: (0, 0))]
        for l in stage:
            inputs.append(l["w"])
            in_specs.append(pl.BlockSpec(l["w"].shape, lambda i: (0, 0)))
            if not l["bn"]:
                inputs.append(l["b"])
                in_specs.append(pl.BlockSpec(l["b"].shape, lambda i: (0, 0)))

        p_out = stage[-1]["p_out"]
        o_shapes = [jax.ShapeDtypeStruct((padded, p_out), out_dtype)]
        o_specs = [pl.BlockSpec((tb, p_out), lambda i: (i, 0))]
        if emit_stats:
            o_shapes.append(jax.ShapeDtypeStruct((n_tiles, 2, p_out), jnp.float32))
            o_specs.append(pl.BlockSpec((1, 2, p_out), lambda i: (i, 0, 0)))

        result = pl.pallas_call(
            kernel,
            grid=(n_tiles,),
            in_specs=in_specs,
            out_specs=tuple(o_specs) if emit_stats else o_specs[0],
            out_shape=tuple(o_shapes) if emit_stats else o_shapes[0],
            compiler_params=cparams,
        )(*inputs)

        if emit_stats:
            a, stats = result
            pending_bn = (stats, stage[-1]["gamma_beta"])
        else:
            a = result
            pending_bn = None
    return a


def autoencoder_forward_pallas(x, params, *, batch_tile=None):
    assert x.ndim == 2 and x.shape[1] == params[0]["in_dim"]
    batch = x.shape[0]
    out_dim = params[-1]["out_dim"]
    orig_dtype = x.dtype
    xf = x.astype(jnp.float32)

    vmem_limit = _vmem_budget_bytes()
    if batch_tile is None and _fused_bytes_estimate(params, batch) <= vmem_limit:
        out = _forward_fused(xf, params, vmem_limit)       # one fused call
    else:
        tb = DEFAULT_BATCH_TILE if batch_tile is None else int(batch_tile)
        tb = max(16, _round_up(tb, 16))                    # bf16 sublane aligned
        tb = min(tb, _round_up(batch, 16))
        out = _forward_staged(xf, params, tb, vmem_limit)  # two-pass-BN pipeline
    return out[:batch, :out_dim].astype(orig_dtype)


# ----------------------------------------------------------------------------
# Plain-JAX reference (PyTorch module semantics) for the sanity check
# ----------------------------------------------------------------------------
def autoencoder_forward_ref(x, params):
    """Module semantics: every Linear keeps its bias, training-mode BatchNorm1d.
    Uses the same bf16 weights / bf16-cast activations as the kernels so the
    comparison is apples-to-apples."""
    y = x.astype(jnp.float32)
    for l in params:
        w = l["w"][:l["in_dim"], :l["out_dim"]]
        b = l["b"][:, :l["out_dim"]]
        y = jnp.dot(y.astype(jnp.bfloat16), w,
                    preferred_element_type=jnp.float32) + b
        if l["bn"]:
            gamma = l["gamma_beta"][0:1, :l["out_dim"]]
            beta = l["gamma_beta"][1:2, :l["out_dim"]]
            mean = jnp.mean(y, axis=0, keepdims=True)
            var = jnp.mean(jnp.square(y - mean), axis=0, keepdims=True)
            y = (y - mean) * jax.lax.rsqrt(var + EPS) * gamma + beta
            y = jnp.tanh(y)
    return y.astype(x.dtype)


if __name__ == "__main__":
    # Shapes consistent with the module: AutoEncoder(input_dim=16,
    # encoder_hidden_sizes=[32, 32], latent_dim=4).
    input_dim = 16
    encoder_hidden_sizes = [32, 32]
    latent_dim = 4

    key = jax.random.PRNGKey(0)
    key, kx, kp = jax.random.split(key, 3)
    params, _ = init_autoencoder_params(kp, input_dim, encoder_hidden_sizes,
                                        latent_dim)

    # 1) Fused single-call path (default dispatch: working set << VMEM budget).
    batch = 128
    x = jax.random.normal(kx, (batch, input_dim), dtype=jnp.float32)
    ref = autoencoder_forward_ref(x, params)
    out_fused = jax.block_until_ready(autoencoder_forward_pallas(x, params))
    assert out_fused.shape == (batch, input_dim)
    # bf16 MXU operands => compare at bf16-level tolerance.
    assert jnp.allclose(out_fused, ref, atol=5e-3, rtol=5e-3), \
        float(jnp.max(jnp.abs(out_fused - ref)))

    # 2) Batch-tiled two-pass-BatchNorm pipeline, forced via explicit
    #    batch_tile, with a non-divisible batch (exercises row padding and the
    #    masked full-batch statistics).
    batch2 = 100
    key, kx2 = jax.random.split(key)
    x2 = jax.random.normal(kx2, (batch2, input_dim), dtype=jnp.float32)
    ref2 = autoencoder_forward_ref(x2, params)
    out_staged = jax.block_until_ready(
        autoencoder_forward_pallas(x2, params, batch_tile=32))
    assert out_staged.shape == (batch2, input_dim)
    # Inter-stage activations are bf16 in the staged path -> slightly looser
    # tolerance than the fused path.
    assert jnp.allclose(out_staged, ref2, atol=3e-2, rtol=3e-2), \
        float(jnp.max(jnp.abs(out_staged - ref2)))

    print("KERNEL_OK")
</pallas_src>

<mosaic_0001>
module attributes {stable_mosaic.version = 11 : i64} {
  func.func @kernel(%arg0: memref<128x16xf32, #tpu.memory_space<vmem>>, %arg1: memref<16x128xbf16, #tpu.memory_space<vmem>>, %arg2: memref<2x128xf32, #tpu.memory_space<vmem>>, %arg3: memref<128x128xbf16, #tpu.memory_space<vmem>>, %arg4: memref<2x128xf32, #tpu.memory_space<vmem>>, %arg5: memref<128x128xbf16, #tpu.memory_space<vmem>>, %arg6: memref<1x128xf32, #tpu.memory_space<vmem>>, %arg7: memref<128x128xbf16, #tpu.memory_space<vmem>>, %arg8: memref<2x128xf32, #tpu.memory_space<vmem>>, %arg9: memref<128x128xbf16, #tpu.memory_space<vmem>>, %arg10: memref<2x128xf32, #tpu.memory_space<vmem>>, %arg11: memref<128x128xbf16, #tpu.memory_space<vmem>>, %arg12: memref<1x128xf32, #tpu.memory_space<vmem>>, %arg13: memref<128x128xf32, #tpu.memory_space<vmem>>) attributes {dimension_semantics = [], scalar_prefetch = 0 : i64, scratch_operands = 0 : i64, tpu.core_type = #tpu.core_type<tc>} {
    %c0 = arith.constant 0 : index
    %c0_0 = arith.constant 0 : index
    %0 = vector.load %arg0[%c0, %c0_0] : memref<128x16xf32, #tpu.memory_space<vmem>>, vector<128x16xf32>
    %c0_1 = arith.constant 0 : index
    %c0_2 = arith.constant 0 : index
    %1 = vector.load %arg1[%c0_1, %c0_2] : memref<16x128xbf16, #tpu.memory_space<vmem>>, vector<16x128xbf16>
    %c0_3 = arith.constant 0 : index
    %c0_4 = arith.constant 0 : index
    %2 = vector.load %arg2[%c0_3, %c0_4] : memref<2x128xf32, #tpu.memory_space<vmem>>, vector<2x128xf32>
    %3 = arith.truncf %0 : vector<128x16xf32> to vector<128x16xbf16>
    %cst = arith.constant dense<0.000000e+00> : vector<128x128xf32>
    %4 = tpu.matmul %3, %1, %cst {dimension_numbers = #tpu.dot_dimension_numbers<[1], [0], [0], [1], [0, 0, 1, 1], [], []>} : vector<128x16xbf16>, vector<16x128xbf16>, vector<128x128xf32> -> vector<128x128xf32>
    %cst_5 = arith.constant dense<0.000000e+00> : vector<128xf32>
    %5 = vector.multi_reduction <add>, %4, %cst_5 [0] : vector<128x128xf32> to vector<128xf32>
    %6 = vector.shape_cast %5 : vector<128xf32> to vector<1x128xf32>
    %7 = arith.mulf %4, %4 : vector<128x128xf32>
    %cst_6 = arith.constant dense<0.000000e+00> : vector<128xf32>
    %8 = vector.multi_reduction <add>, %7, %cst_6 [0] : vector<128x128xf32> to vector<128xf32>
    %9 = vector.shape_cast %8 : vector<128xf32> to vector<1x128xf32>
    %cst_7 = arith.constant 7.812500e-03 : f32
    %10 = vector.broadcast %cst_7 : f32 to vector<1x128xf32>
    %11 = arith.mulf %6, %10 : vector<1x128xf32>
    %cst_8 = arith.constant 7.812500e-03 : f32
    %12 = vector.broadcast %cst_8 : f32 to vector<1x128xf32>
    %13 = arith.mulf %9, %12 : vector<1x128xf32>
    %14 = arith.mulf %11, %11 : vector<1x128xf32>
    %15 = arith.subf %13, %14 : vector<1x128xf32>
    %cst_9 = arith.constant 0.000000e+00 : f32
    %16 = vector.broadcast %cst_9 : f32 to vector<1x128xf32>
    %17 = arith.maximumf %15, %16 : vector<1x128xf32>
    %18 = vector.extract_strided_slice %2 {offsets = [0, 0], sizes = [1, 128], strides = [1, 1]} : vector<2x128xf32> to vector<1x128xf32>
    %cst_10 = arith.constant 9.99999974E-6 : f32
    %19 = vector.broadcast %cst_10 : f32 to vector<1x128xf32>
    %20 = arith.addf %17, %19 : vector<1x128xf32>
    %21 = math.rsqrt %20 : vector<1x128xf32>
    %22 = arith.mulf %18, %21 : vector<1x128xf32>
    %23 = vector.extract_strided_slice %2 {offsets = [1, 0], sizes = [1, 128], strides = [1, 1]} : vector<2x128xf32> to vector<1x128xf32>
    %24 = arith.mulf %11, %22 : vector<1x128xf32>
    %25 = arith.subf %23, %24 : vector<1x128xf32>
    %26 = vector.broadcast %22 : vector<1x128xf32> to vector<128x128xf32>
    %27 = arith.mulf %4, %26 : vector<128x128xf32>
    %28 = vector.broadcast %25 : vector<1x128xf32> to vector<128x128xf32>
    %29 = arith.addf %27, %28 : vector<128x128xf32>
    %30 = math.tanh %29 : vector<128x128xf32>
    %c0_11 = arith.constant 0 : index
    %c0_12 = arith.constant 0 : index
    %31 = vector.load %arg3[%c0_11, %c0_12] : memref<128x128xbf16, #tpu.memory_space<vmem>>, vector<128x128xbf16>
    %c0_13 = arith.constant 0 : index
    %c0_14 = arith.constant 0 : index
    %32 = vector.load %arg4[%c0_13, %c0_14] : memref<2x128xf32, #tpu.memory_space<vmem>>, vector<2x128xf32>
    %33 = arith.truncf %30 : vector<128x128xf32> to vector<128x128xbf16>
    %cst_15 = arith.constant dense<0.000000e+00> : vector<128x128xf32>
    %34 = tpu.matmul %33, %31, %cst_15 {dimension_numbers = #tpu.dot_dimension_numbers<[1], [0], [0], [1], [0, 0, 1, 1], [], []>} : vector<128x128xbf16>, vector<128x128xbf16>, vector<128x128xf32> -> vector<128x128xf32>
    %cst_16 = arith.constant dense<0.000000e+00> : vector<128xf32>
    %35 = vector.multi_reduction <add>, %34, %cst_16 [0] : vector<128x128xf32> to vector<128xf32>
    %36 = vector.shape_cast %35 : vector<128xf32> to vector<1x128xf32>
    %37 = arith.mulf %34, %34 : vector<128x128xf32>
    %cst_17 = arith.constant dense<0.000000e+00> : vector<128xf32>
    %38 = vector.multi_reduction <add>, %37, %cst_17 [0] : vector<128x128xf32> to vector<128xf32>
    %39 = vector.shape_cast %38 : vector<128xf32> to vector<1x128xf32>
    %cst_18 = arith.constant 7.812500e-03 : f32
    %40 = vector.broadcast %cst_18 : f32 to vector<1x128xf32>
    %41 = arith.mulf %36, %40 : vector<1x128xf32>
    %cst_19 = arith.constant 7.812500e-03 : f32
    %42 = vector.broadcast %cst_19 : f32 to vector<1x128xf32>
    %43 = arith.mulf %39, %42 : vector<1x128xf32>
    %44 = arith.mulf %41, %41 : vector<1x128xf32>
    %45 = arith.subf %43, %44 : vector<1x128xf32>
    %cst_20 = arith.constant 0.000000e+00 : f32
    %46 = vector.broadcast %cst_20 : f32 to vector<1x128xf32>
    %47 = arith.maximumf %45, %46 : vector<1x128xf32>
    %48 = vector.extract_strided_slice %32 {offsets = [0, 0], sizes = [1, 128], strides = [1, 1]} : vector<2x128xf32> to vector<1x128xf32>
    %cst_21 = arith.constant 9.99999974E-6 : f32
    %49 = vector.broadcast %cst_21 : f32 to vector<1x128xf32>
    %50 = arith.addf %47, %49 : vector<1x128xf32>
    %51 = math.rsqrt %50 : vector<1x128xf32>
    %52 = arith.mulf %48, %51 : vector<1x128xf32>
    %53 = vector.extract_strided_slice %32 {offsets = [1, 0], sizes = [1, 128], strides = [1, 1]} : vector<2x128xf32> to vector<1x128xf32>
    %54 = arith.mulf %41, %52 : vector<1x128xf32>
    %55 = arith.subf %53, %54 : vector<1x128xf32>
    %56 = vector.broadcast %52 : vector<1x128xf32> to vector<128x128xf32>
    %57 = arith.mulf %34, %56 : vector<128x128xf32>
    %58 = vector.broadcast %55 : vector<1x128xf32> to vector<128x128xf32>
    %59 = arith.addf %57, %58 : vector<128x128xf32>
    %60 = math.tanh %59 : vector<128x128xf32>
    %c0_22 = arith.constant 0 : index
    %c0_23 = arith.constant 0 : index
    %61 = vector.load %arg5[%c0_22, %c0_23] : memref<128x128xbf16, #tpu.memory_space<vmem>>, vector<128x128xbf16>
    %c0_24 = arith.constant 0 : index
    %c0_25 = arith.constant 0 : index
    %62 = vector.load %arg6[%c0_24, %c0_25] : memref<1x128xf32, #tpu.memory_space<vmem>>, vector<1x128xf32>
    %63 = arith.truncf %60 : vector<128x128xf32> to vector<128x128xbf16>
    %cst_26 = arith.constant dense<0.000000e+00> : vector<128x128xf32>
    %64 = tpu.matmul %63, %61, %cst_26 {dimension_numbers = #tpu.dot_dimension_numbers<[1], [0], [0], [1], [0, 0, 1, 1], [], []>} : vector<128x128xbf16>, vector<128x128xbf16>, vector<128x128xf32> -> vector<128x128xf32>
    %65 = vector.broadcast %62 : vector<1x128xf32> to vector<128x128xf32>
    %66 = arith.addf %64, %65 : vector<128x128xf32>
    %c0_27 = arith.constant 0 : index
    %c0_28 = arith.constant 0 : index
    %67 = vector.load %arg7[%c0_27, %c0_28] : memref<128x128xbf16, #tpu.memory_space<vmem>>, vector<128x128xbf16>
    %c0_29 = arith.constant 0 : index
    %c0_30 = arith.constant 0 : index
    %68 = vector.load %arg8[%c0_29, %c0_30] : memref<2x128xf32, #tpu.memory_space<vmem>>, vector<2x128xf32>
    %69 = arith.truncf %66 : vector<128x128xf32> to vector<128x128xbf16>
    %cst_31 = arith.constant dense<0.000000e+00> : vector<128x128xf32>
    %70 = tpu.matmul %69, %67, %cst_31 {dimension_numbers = #tpu.dot_dimension_numbers<[1], [0], [0], [1], [0, 0, 1, 1], [], []>} : vector<128x128xbf16>, vector<128x128xbf16>, vector<128x128xf32> -> vector<128x128xf32>
    %cst_32 = arith.constant dense<0.000000e+00> : vector<128xf32>
    %71 = vector.multi_reduction <add>, %70, %cst_32 [0] : vector<128x128xf32> to vector<128xf32>
    %72 = vector.shape_cast %71 : vector<128xf32> to vector<1x128xf32>
    %73 = arith.mulf %70, %70 : vector<128x128xf32>
    %cst_33 = arith.constant dense<0.000000e+00> : vector<128xf32>
    %74 = vector.multi_reduction <add>, %73, %cst_33 [0] : vector<128x128xf32> to vector<128xf32>
    %75 = vector.shape_cast %74 : vector<128xf32> to vector<1x128xf32>
    %cst_34 = arith.constant 7.812500e-03 : f32
    %76 = vector.broadcast %cst_34 : f32 to vector<1x128xf32>
    %77 = arith.mulf %72, %76 : vector<1x128xf32>
    %cst_35 = arith.constant 7.812500e-03 : f32
    %78 = vector.broadcast %cst_35 : f32 to vector<1x128xf32>
    %79 = arith.mulf %75, %78 : vector<1x128xf32>
    %80 = arith.mulf %77, %77 : vector<1x128xf32>
    %81 = arith.subf %79, %80 : vector<1x128xf32>
    %cst_36 = arith.constant 0.000000e+00 : f32
    %82 = vector.broadcast %cst_36 : f32 to vector<1x128xf32>
    %83 = arith.maximumf %81, %82 : vector<1x128xf32>
    %84 = vector.extract_strided_slice %68 {offsets = [0, 0], sizes = [1, 128], strides = [1, 1]} : vector<2x128xf32> to vector<1x128xf32>
    %cst_37 = arith.constant 9.99999974E-6 : f32
    %85 = vector.broadcast %cst_37 : f32 to vector<1x128xf32>
    %86 = arith.addf %83, %85 : vector<1x128xf32>
    %87 = math.rsqrt %86 : vector<1x128xf32>
    %88 = arith.mulf %84, %87 : vector<1x128xf32>
    %89 = vector.extract_strided_slice %68 {offsets = [1, 0], sizes = [1, 128], strides = [1, 1]} : vector<2x128xf32> to vector<1x128xf32>
    %90 = arith.mulf %77, %88 : vector<1x128xf32>
    %91 = arith.subf %89, %90 : vector<1x128xf32>
    %92 = vector.broadcast %88 : vector<1x128xf32> to vector<128x128xf32>
    %93 = arith.mulf %70, %92 : vector<128x128xf32>
    %94 = vector.broadcast %91 : vector<1x128xf32> to vector<128x128xf32>
    %95 = arith.addf %93, %94 : vector<128x128xf32>
    %96 = math.tanh %95 : vector<128x128xf32>
    %c0_38 = arith.constant 0 : index
    %c0_39 = arith.constant 0 : index
    %97 = vector.load %arg9[%c0_38, %c0_39] : memref<128x128xbf16, #tpu.memory_space<vmem>>, vector<128x128xbf16>
    %c0_40 = arith.constant 0 : index
    %c0_41 = arith.constant 0 : index
    %98 = vector.load %arg10[%c0_40, %c0_41] : memref<2x128xf32, #tpu.memory_space<vmem>>, vector<2x128xf32>
    %99 = arith.truncf %96 : vector<128x128xf32> to vector<128x128xbf16>
    %cst_42 = arith.constant dense<0.000000e+00> : vector<128x128xf32>
    %100 = tpu.matmul %99, %97, %cst_42 {dimension_numbers = #tpu.dot_dimension_numbers<[1], [0], [0], [1], [0, 0, 1, 1], [], []>} : vector<128x128xbf16>, vector<128x128xbf16>, vector<128x128xf32> -> vector<128x128xf32>
    %cst_43 = arith.constant dense<0.000000e+00> : vector<128xf32>
    %101 = vector.multi_reduction <add>, %100, %cst_43 [0] : vector<128x128xf32> to vector<128xf32>
    %102 = vector.shape_cast %101 : vector<128xf32> to vector<1x128xf32>
    %103 = arith.mulf %100, %100 : vector<128x128xf32>
    %cst_44 = arith.constant dense<0.000000e+00> : vector<128xf32>
    %104 = vector.multi_reduction <add>, %103, %cst_44 [0] : vector<128x128xf32> to vector<128xf32>
    %105 = vector.shape_cast %104 : vector<128xf32> to vector<1x128xf32>
    %cst_45 = arith.constant 7.812500e-03 : f32
    %106 = vector.broadcast %cst_45 : f32 to vector<1x128xf32>
    %107 = arith.mulf %102, %106 : vector<1x128xf32>
    %cst_46 = arith.constant 7.812500e-03 : f32
    %108 = vector.broadcast %cst_46 : f32 to vector<1x128xf32>
    %109 = arith.mulf %105, %108 : vector<1x128xf32>
    %110 = arith.mulf %107, %107 : vector<1x128xf32>
    %111 = arith.subf %109, %110 : vector<1x128xf32>
    %cst_47 = arith.constant 0.000000e+00 : f32
    %112 = vector.broadcast %cst_47 : f32 to vector<1x128xf32>
    %113 = arith.maximumf %111, %112 : vector<1x128xf32>
    %114 = vector.extract_strided_slice %98 {offsets = [0, 0], sizes = [1, 128], strides = [1, 1]} : vector<2x128xf32> to vector<1x128xf32>
    %cst_48 = arith.constant 9.99999974E-6 : f32
    %115 = vector.broadcast %cst_48 : f32 to vector<1x128xf32>
    %116 = arith.addf %113, %115 : vector<1x128xf32>
    %117 = math.rsqrt %116 : vector<1x128xf32>
    %118 = arith.mulf %114, %117 : vector<1x128xf32>
    %119 = vector.extract_strided_slice %98 {offsets = [1, 0], sizes = [1, 128], strides = [1, 1]} : vector<2x128xf32> to vector<1x128xf32>
    %120 = arith.mulf %107, %118 : vector<1x128xf32>
    %121 = arith.subf %119, %120 : vector<1x128xf32>
    %122 = vector.broadcast %118 : vector<1x128xf32> to vector<128x128xf32>
    %123 = arith.mulf %100, %122 : vector<128x128xf32>
    %124 = vector.broadcast %121 : vector<1x128xf32> to vector<128x128xf32>
    %125 = arith.addf %123, %124 : vector<128x128xf32>
    %126 = math.tanh %125 : vector<128x128xf32>
    %c0_49 = arith.constant 0 : index
    %c0_50 = arith.constant 0 : index
    %127 = vector.load %arg11[%c0_49, %c0_50] : memref<128x128xbf16, #tpu.memory_space<vmem>>, vector<128x128xbf16>
    %c0_51 = arith.constant 0 : index
    %c0_52 = arith.constant 0 : index
    %128 = vector.load %arg12[%c0_51, %c0_52] : memref<1x128xf32, #tpu.memory_space<vmem>>, vector<1x128xf32>
    %129 = arith.truncf %126 : vector<128x128xf32> to vector<128x128xbf16>
    %cst_53 = arith.constant dense<0.000000e+00> : vector<128x128xf32>
    %130 = tpu.matmul %129, %127, %cst_53 {dimension_numbers = #tpu.dot_dimension_numbers<[1], [0], [0], [1], [0, 0, 1, 1], [], []>} : vector<128x128xbf16>, vector<128x128xbf16>, vector<128x128xf32> -> vector<128x128xf32>
    %131 = vector.broadcast %128 : vector<1x128xf32> to vector<128x128xf32>
    %132 = arith.addf %130, %131 : vector<128x128xf32>
    %c0_54 = arith.constant 0 : index
    %c0_55 = arith.constant 0 : index
    %133 = vector.load %arg13[%c0_54, %c0_55] : memref<128x128xf32, #tpu.memory_space<vmem>>, vector<128x128xf32>
    tpu.vector_store %arg13[%c0_54, %c0_55], %132 {strides = array<i32>} : memref<128x128xf32, #tpu.memory_space<vmem>>, vector<128x128xf32>,
    return
  }
}

</mosaic_0001>

<bundles_post_ra>
// kernel: tpu_custom_call.1
= control target key start
LH: loop header
LB: loop body
LE: loop exit
PB: predicated region body
PF: predicated region fallthrough
CT: control target
= control target key end

     0   :  { %18 = vsyncpa [#allocation3], 0  ;;  %s2856_s0 = inlined_call_operand.vmem [shape: f32[128,16], index: 0, kind: input, shape index: {}]   ;;  %s2857_s1 = inlined_call_operand.vmem [shape: bf16[16,128], index: 1, kind: input, shape index: {}]   ;;  %s2858_s2 = inlined_call_operand.vmem [shape: f32[2,128], index: 2, kind: input, shape index: {}]   ;;  %s2859_s3 = inlined_call_operand.vmem [shape: bf16[128,128], index: 3, kind: input, shape index: {}]   ;;  %s2860_s4 = inlined_call_operand.vmem [shape: f32[2,128], index: 4, kind: input, shape index: {}]   ;;  %s2861_s5 = inlined_call_operand.vmem [shape: bf16[128,128], index: 5, kind: input, shape index: {}]   ;;  %s2862_s6 = inlined_call_operand.vmem [shape: f32[1,128], index: 6, kind: input, shape index: {}]   ;;  %s2863_s7 = inlined_call_operand.hbm [shape: bf16[128,128], index: 7, kind: input, shape index: {}]   ;;  %s2864_s8 = inlined_call_operand.vmem [shape: f32[2,128], index: 8, kind: input, shape index: {}]   ;;  %s2865_s9 = inlined_call_operand.hbm [shape: bf16[128,128], index: 9, kind: input, shape index: {}]   ;;  %s2866_s10 = inlined_call_operand.vmem [shape: f32[2,128], index: 10, kind: input, shape index: {}]   ;;  %s2867_s11 = inlined_call_operand.hbm [shape: bf16[128,128], index: 11, kind: input, shape index: {}]   ;;  %s2868_s12 = inlined_call_operand.vmem [shape: f32[1,128], index: 12, kind: input, shape index: {}]   ;;  %s2869_s13 = inlined_call_operand.hbm [shape: f32[128,128], index: 13, kind: output, shape index: {}]  }
   0x1   :  { %19 = vsyncpa [#allocation6], 0 }
   0x2   :  { %20 = vsyncpa [#allocation4], 0  ;;  %s2251_s25 = smov [#allocation5]   ;;  %s2252_s27 = smov [#allocation2]  }
   0x3   :  { %s54_s26 = sshll.u32 %s2251_s25, 4  ;;  %s40_s28 = sshll.u32 %s2252_s27, 4  ;;  %s55_s26 = int_to_ptr.vmem [resolvable:$true] %s54_s26  ;;  %s41_s28 = int_to_ptr.vmem [resolvable:$true] %s40_s28 }
   0x4   :  { %s2173_s29 = scalar_lea.vmem %s55_s26, 1024  ;;  %p2178_p1 = scmp.lt.s32.totalorder %s55_s26, %s55_s26 }
   0x5   :  { %p2174_p0 = scmp.ne.s32.totalorder %s55_s26, %s2173_s29  ;;  %p2179_p2 = scmp.lt.s32.totalorder %s2173_s29, %s2173_s29 }
   0x7   :  { %p2180_p3 = por %p2179_p2, %p2178_p1 }
   0x9   :  { %p2181_p4 = pnand %p2180_p3, %p2174_p0 }
   0xb   :  { %2184 = shalt.err (!%p2181_p4)
}
   0xc   :  { %s2253_s30 = smov 64   ;;  %s2254_s14 = smov 4  }
   0xd   :  { %60 = dma.hbm_to_vmem [thread:$0]  %s2865_s9, 1024, %s55_s26, [#allocation6], %s2253_s30, %s2253_s30, %s2254_s14  }
   0xe   :  { %s2193_s17 = scalar_lea.vmem %s41_s28, 1024  ;;  %p2198_p6 = scmp.lt.s32.totalorder %s41_s28, %s41_s28 }
   0xf   :  { %p2194_p5 = scmp.ne.s32.totalorder %s41_s28, %s2193_s17  ;;  %p2199_p7 = scmp.lt.s32.totalorder %s2193_s17, %s2193_s17 }
  0x11   :  { %p2200_p8 = por %p2199_p7, %p2198_p6 }
  0x13   :  { %p2201_p9 = pnand %p2200_p8, %p2194_p5 }
  0x15   :  { %2204 = shalt.err (!%p2201_p9)
}
  0x16   :  { %46 = dma.hbm_to_vmem [thread:$0]  %s2863_s7, 1024, %s41_s28, [#allocation3], %s2253_s30, %s2253_s30, %s2254_s14  }
  0x17   :  { %s2255_s20 = smov [#allocation7]  }
  0x18   :  { %s68_s21 = sshll.u32 %s2255_s20, 4  ;;  %s69_s21 = int_to_ptr.vmem [resolvable:$true] %s68_s21 }
  0x19   :  { %s2213_s22 = scalar_lea.vmem %s69_s21, 1024  ;;  %p2218_p11 = scmp.lt.s32.totalorder %s69_s21, %s69_s21 }
  0x1a   :  { %p2214_p10 = scmp.ne.s32.totalorder %s69_s21, %s2213_s22  ;;  %p2219_p12 = scmp.lt.s32.totalorder %s2213_s22, %s2213_s22 }
  0x1c   :  { %p2220_p13 = por %p2219_p12, %p2218_p11 }
  0x1e   :  { %p2221_p0 = pnand %p2220_p13, %p2214_p10 }
  0x20   :  { %2224 = shalt.err (!%p2221_p0)
}
  0x21   :  { %74 = dma.hbm_to_vmem [thread:$0]  %s2867_s11, 1024, %s69_s21, [#allocation6], %s2253_s30, %s2253_s30, %s2254_s14  }
  0x22   :  { %2245 = dma.done.wait [#allocation3], 1024  }
  0x23   :  { %2246 = vsyncadd [#allocation3], 4294966272 }
  0x24   :  { %2247 = dma.done.wait [#allocation6], 2048  }
  0x25   :  { %2248 = vsyncadd [#allocation6], 4294965248  ;;  %v1988_v0 = vld [vmem:[%s2857_s1] sm:$0xff]   ;;  %v88_v2 = vld [vmem:[%s2856_s0 + $0x8] sm:$0xff]  ;;  %vm120_vm0 = vcmask 130048  }
  0x26   :  { %v87_v1 = vld [vmem:[%s2856_s0] sm:$0xff]  ;;  %v89_v3 = vld [vmem:[%s2856_s0 + $0x10] sm:$0xff]  ;;  %1786 = vmatprep.subr.bf16.mxu0 %v1988_v0  ;;  %v90_v5 = vld [vmem:[%s2856_s0 + $0x18] sm:$0xff] }
  0x27   :  { %v106_v4 = vpack.c.bf16 %v88_v2, %v87_v1  ;;  %v91_v6 = vld [vmem:[%s2856_s0 + $0x20] sm:$0xff]  ;;  %v92_v7 = vld [vmem:[%s2856_s0 + $0x28] sm:$0xff]  ;;  %1787 = vmatpush3.bf16.msra.mxu0 %v1988_v0  ;;  %v107_v8 = vpack.c.bf16 %v90_v5, %v89_v3  ;;  %v93_v10 = vld [vmem:[%s2856_s0 + $0x30] sm:$0xff] }
  0x28   :  { %v108_v9 = vpack.c.bf16 %v92_v7, %v91_v6  ;;  %v94_v11 = vld [vmem:[%s2856_s0 + $0x38] sm:$0xff]  ;;  %v95_v12 = vld [vmem:[%s2856_s0 + $0x40] sm:$0xff]  ;;  %v96_v13 = vld [vmem:[%s2856_s0 + $0x48] sm:$0xff] }
  0x29   :  { %1788 = vmatprep.mubr.msk.bf16.mxu0 %vm120_vm0, %v106_v4  ;;  %v109_v14 = vpack.c.bf16 %v94_v11, %v93_v10  ;;  %v110_v15 = vpack.c.bf16 %v96_v13, %v95_v12  ;;  %v97_v16 = vld [vmem:[%s2856_s0 + $0x50] sm:$0xff]  ;;  %v98_v17 = vld [vmem:[%s2856_s0 + $0x58] sm:$0xff]  ;;  %v99_v18 = vld [vmem:[%s2856_s0 + $0x60] sm:$0xff] }
  0x2a   :  { %1789 = vmatmul.mubr.msk.bf16.vlgmr.msra.gmra.mxu0 %vm120_vm0, %v107_v8  ;;  %v100_v19 = vld [vmem:[%s2856_s0 + $0x68] sm:$0xff]  ;;  %v111_v20 = vpack.c.bf16 %v98_v17, %v97_v16  ;;  %v101_v22 = vld [vmem:[%s2856_s0 + $0x70] sm:$0xff]  ;;  %v102_v23 = vld [vmem:[%s2856_s0 + $0x78] sm:$0xff] }
  0x2b   :  { %1792 = vmatprep.mubr.msk.bf16.mxu0 %vm120_vm0, %v108_v9  ;;  %v112_v21 = vpack.c.bf16 %v100_v19, %v99_v18  ;;  %v113_v24 = vpack.c.bf16 %v102_v23, %v101_v22  ;;  %v1989_v25 = vld [vmem:[%s2859_s3 + $0x38] sm:$0xff]   ;;  %v1990_v26 = vld [vmem:[%s2859_s3 + $0x30] sm:$0xff]   ;;  %v1991_v27 = vld [vmem:[%s2859_s3 + $0x28] sm:$0xff]  }
  0x2c   :  { %1804 = vmatprep.subr.bf16.mxu1 %v1989_v25  ;;  %v1992_v28 = vld [vmem:[%s2859_s3 + $0x20] sm:$0xff]   ;;  %v1993_v29 = vld [vmem:[%s2859_s3 + $0x18] sm:$0xff]   ;;  %v1994_v30 = vld [vmem:[%s2859_s3 + $0x10] sm:$0xff]  }
  0x2d   :  { %1805 = vmatpush3.bf16.msra.mxu1 %v1989_v25  ;;  %v1995_v31 = vld [vmem:[%s2859_s3 + $0x8] sm:$0xff]   ;;  %v1996_v32 = vld [vmem:[%s2859_s3] sm:$0xff]  }
  0x2e   :  { %1806 = vmatprep.subr.bf16.mxu1 %v1990_v26 }
  0x31   :  { %1807 = vmatpush3.bf16.msra.mxu1 %v1990_v26 }
  0x32   :  { %1793 = vmatmul.mubr.msk.bf16.gmra.mxu0 %vm120_vm0, %v109_v14  ;;  %1808 = vmatprep.subr.bf16.mxu1 %v1991_v27 }
  0x33   :  { %1796 = vmatprep.mubr.msk.bf16.mxu0 %vm120_vm0, %v110_v15 }
  0x35   :  { %1809 = vmatpush3.bf16.msra.mxu1 %v1991_v27 }
  0x36   :  { %1810 = vmatprep.subr.bf16.mxu1 %v1992_v28 }
  0x39   :  { %1811 = vmatpush3.bf16.msra.mxu1 %v1992_v28 }
  0x3a   :  { %1797 = vmatmul.mubr.msk.bf16.gmra.mxu0 %vm120_vm0, %v111_v20  ;;  %1812 = vmatprep.subr.bf16.mxu1 %v1993_v29 }
  0x3b   :  { %1800 = vmatprep.mubr.msk.bf16.mxu0 %vm120_vm0, %v112_v21 }
  0x3d   :  { %1813 = vmatpush3.bf16.msra.mxu1 %v1993_v29 }
  0x3e   :  { %1814 = vmatprep.subr.bf16.mxu1 %v1994_v30 }
  0x41   :  { %1815 = vmatpush3.bf16.msra.mxu1 %v1994_v30 }
  0x42   :  { %1801 = vmatmul.mubr.msk.bf16.gmra.mxu0 %vm120_vm0, %v113_v24  ;;  %1816 = vmatprep.subr.bf16.mxu1 %v1995_v31 }
  0x45   :  { %1817 = vmatpush3.bf16.msra.mxu1 %v1995_v31 }
  0x46   :  { %1818 = vmatprep.subr.bf16.mxu1 %v1996_v32 }
  0x49   :  { %1819 = vmatpush3.bf16.msra.mxu1 %v1996_v32 }
  0xea   :  { %v2421_v33 = vpop.f32.mrf.mxu0 }
  0xeb   :  { %v265_v41 = vmul.f32 %v2421_v33, %v2421_v33 }
  0xec   :  { %v2423_v34 = vpop.f32.mrf.mxu0 }
  0xed   :  { %v263_v37 = vmul.f32 %v2423_v34, %v2423_v34 }
  0xee   :  { %v2425_v35 = vpop.f32.mrf.mxu0 }
  0xef   :  { %v266_v45 = vmul.f32 %v2425_v35, %v2425_v35 }
  0xf0   :  { %v2427_v36 = vpop.f32.mrf.mxu0 }
  0xf1   :  { %v242_v38 = vadd.f32 %v2427_v36, %v2423_v34  ;;  %v264_v39 = vmul.f32 %v2427_v36, %v2427_v36 }
  0xf2   :  { %v2435_v40 = vpop.f32.mrf.mxu0 }
  0xf3   :  { %v243_v42 = vadd.f32 %v2421_v33, %v242_v38  ;;  %v279_v43 = vadd.f32 %v264_v39, %v263_v37  ;;  %v269_v57 = vmul.f32 %v2435_v40, %v2435_v40 }
  0xf4   :  { %v2440_v44 = vpop.f32.mrf.mxu0 }
  0xf5   :  { %v280_v46 = vadd.f32 %v279_v43, %v265_v41  ;;  %v244_v47 = vadd.f32 %v2425_v35, %v243_v42  ;;  %v267_v50 = vmul.f32 %v2440_v44, %v2440_v44 }
  0xf6   :  { %v2445_v48 = vpop.f32.mrf.mxu0 }
  0xf7   :  { %v245_v49 = vadd.f32 %v244_v47, %v2440_v44  ;;  %v281_v51 = vadd.f32 %v280_v46, %v266_v45  ;;  %v270_v61 = vmul.f32 %v2445_v48, %v2445_v48 }
  0xf8   :  { %v2450_v52 = vpop.f32.mrf.mxu0 }
  0xf9   :  { %v282_v53 = vadd.f32 %v281_v51, %v267_v50  ;;  %v246_v54 = vadd.f32 %v245_v49, %v2450_v52  ;;  %v268_v55 = vmul.f32 %v2450_v52, %v2450_v52 }
  0xfa   :  { %v2455_v56 = vpop.f32.mrf.mxu0 }
  0xfb   :  { %v247_v58 = vadd.f32 %v2435_v40, %v246_v54  ;;  %v283_v59 = vadd.f32 %v282_v53, %v268_v55  ;;  %v273_v9 = vmul.f32 %v2455_v56, %v2455_v56 }
  0xfc   :  { %v2460_v60 = vpop.f32.mrf.mxu0 }
  0xfd   :  { %v284_v62 = vadd.f32 %v283_v59, %v269_v57  ;;  %v248_v63 = vadd.f32 %v2445_v48, %v247_v58  ;;  %v271_v2 = vmul.f32 %v2460_v60, %v2460_v60  ;;  %v313_v58 = vlaneseq }
  0xfe   :  { %v2465_v0 = vpop.f32.mrf.mxu0 }
  0xff   :  { %v249_v1 = vadd.f32 %v248_v63, %v2460_v60  ;;  %v285_v3 = vadd.f32 %v284_v62, %v270_v61  ;;  %v274_v13 = vmul.f32 %v2465_v0, %v2465_v0  ;;  %v314_v59 = vshrl.u32 %v313_v58, 7  ;;  %v105_v61 = vld [vmem:[%s2858_s2] sm:$0x3] }
 0x100   :  { %v2470_v4 = vpop.f32.mrf.mxu0 }
 0x101   :  { %v286_v5 = vadd.f32 %v285_v3, %v271_v2  ;;  %v250_v6 = vadd.f32 %v249_v1, %v2470_v4  ;;  %v272_v7 = vmul.f32 %v2470_v4, %v2470_v4  ;;  %v2504_v1 = vsub.s32 0, %v314_v59 }
 0x102   :  { %v2475_v8 = vpop.f32.mrf.mxu0 }
 0x103   :  { %v251_v10 = vadd.f32 %v2455_v56, %v250_v6  ;;  %v287_v11 = vadd.f32 %v286_v5, %v272_v7  ;;  %v277_v24 = vmul.f32 %v2475_v8, %v2475_v8  ;;  %v2507_v6 = vsub.s32 1, %v314_v59 }
 0x104   :  { %v2480_v12 = vpop.f32.mrf.mxu0 }
 0x105   :  { %v288_v14 = vadd.f32 %v287_v11, %v273_v9  ;;  %v252_v15 = vadd.f32 %v2465_v0, %v251_v10  ;;  %v275_v18 = vmul.f32 %v2480_v12, %v2480_v12 }
 0x106   :  { %v2485_v16 = vpop.f32.mrf.mxu0 }
 0x107   :  { %v253_v17 = vadd.f32 %v252_v15, %v2480_v12  ;;  %v289_v19 = vadd.f32 %v288_v14, %v274_v13  ;;  %v278_v27 = vmul.f32 %v2485_v16, %v2485_v16 }
 0x108   :  { %v2490_v20 = vpop.f32.mrf.mxu0 }
 0x109   :  { %v290_v21 = vadd.f32 %v289_v19, %v275_v18  ;;  %v254_v22 = vadd.f32 %v253_v17, %v2490_v20  ;;  %v276_v23 = vmul.f32 %v2490_v20, %v2490_v20 }
 0x10b   :  { %v255_v25 = vadd.f32 %v2475_v8, %v254_v22  ;;  %v291_v26 = vadd.f32 %v290_v21, %v276_v23 }
 0x10d   :  { %v256_v28 = vadd.f32 %v2485_v16, %v255_v25  ;;  %v292_v29 = vadd.f32 %v291_v26, %v277_v24 }
 0x10f   :  { %v257_v30 = vrot.slane %v256_v28, 4  ;;  %v293_v31 = vadd.f32 %v292_v29, %v278_v27 }
 0x111   :  { %v258_v32 = vadd.f32 %v257_v30, %v256_v28  ;;  %v294_v37 = vrot.slane %v293_v31, 4 }
 0x113   :  { %v259_v38 = vrot.slane %v258_v32, 2  ;;  %v295_v39 = vadd.f32 %v294_v37, %v293_v31 }
 0x115   :  { %v260_v41 = vadd.f32 %v259_v38, %v258_v32  ;;  %v296_v42 = vrot.slane %v295_v39, 2 }
 0x117   :  { %v261_v43 = vrot.slane %v260_v41, 1  ;;  %v297_v45 = vadd.f32 %v296_v42, %v295_v39 }
 0x119   :  { %v262_v46 = vadd.f32 %v261_v43, %v260_v41  ;;  %v298_v47 = vrot.slane %v297_v45, 1 }
 0x11b   :  { %v299_v49 = vadd.f32 %v298_v47, %v297_v45  ;;  %v300_v50 = vmul.f32 0.0078125, %v262_v46 }
 0x11d   :  { %v301_v51 = vmul.f32 0.0078125, %v299_v49  ;;  %v302_v53 = vmul.f32 %v300_v50, %v300_v50 }
 0x11f   :  { %v303_v54 = vsub.f32 %v301_v51, %v302_v53 }
 0x121   :  { %v304_v55 = vmax.f32 %v303_v54, 0.0 }
 0x123   :  { %v305_v57 = vadd.f32 1e-05, %v304_v55 }
 0x125   :  { %2029 = vrsqrt.f32 %v305_v57 }
 0x132   :  { %v2030_v62 = vpop.eup %2029 }
 0x133   :  { %v307_v63 = vmul.f32 %v2030_v62, %v105_v61 }
 0x135   :  { %v308_v2 = vmul.f32 %v307_v63, %v300_v50  ;;  %v316_v5 = vrot.slane %v307_v63, %v2504_v1  ;;  %v1997_v63 = vld [vmem:[%s2861_s5 + $0x38] sm:$0xff]  }
 0x136   :  { %1836 = vmatprep.subr.bf16.mxu0 %v1997_v63 }
 0x137   :  { %v310_v3 = vrot.slane %v308_v2, 7  ;;  %v317_v10 = vmul.f32 %v316_v5, %v2423_v34  ;;  %v318_v11 = vmul.f32 %v316_v5, %v2427_v36  ;;  %v319_v13 = vmul.f32 %v2421_v33, %v316_v5  ;;  %1837 = vmatpush3.bf16.msra.mxu0 %v1997_v63  ;;  %v1998_v2 = vld [vmem:[%s2861_s5 + $0x30] sm:$0xff]  }
 0x138   :  { %v320_v17 = vmul.f32 %v2425_v35, %v316_v5  ;;  %v321_v19 = vmul.f32 %v316_v5, %v2440_v44  ;;  %v322_v22 = vmul.f32 %v316_v5, %v2450_v52  ;;  %v323_v24 = vmul.f32 %v2435_v40, %v316_v5  ;;  %1838 = vmatprep.subr.bf16.mxu0 %v1998_v2 }
 0x139   :  { %v312_v7 = vsub.f32 %v105_v61, %v310_v3  ;;  %v324_v36 = vmul.f32 %v2445_v48, %v316_v5  ;;  %v325_v25 = vmul.f32 %v316_v5, %v2460_v60  ;;  %v326_v26 = vmul.f32 %v316_v5, %v2470_v4  ;;  %v1999_v3 = vld [vmem:[%s2861_s5 + $0x28] sm:$0xff]  }
 0x13a   :  { %v327_v52 = vmul.f32 %v2455_v56, %v316_v5  ;;  %v328_v40 = vmul.f32 %v2465_v0, %v316_v5  ;;  %v331_v29 = vmul.f32 %v2475_v8, %v316_v5  ;;  %v332_v60 = vmul.f32 %v2485_v16, %v316_v5 }
 0x13b   :  { %v336_v9 = vrot.slane %v312_v7, %v2507_v6  ;;  %v330_v31 = vmul.f32 %v316_v5, %v2490_v20  ;;  %v329_v56 = vmul.f32 %v316_v5, %v2480_v12  ;;  %1839 = vmatpush3.bf16.msra.mxu0 %v1998_v2  ;;  %v2000_v5 = vld [vmem:[%s2861_s5 + $0x20] sm:$0xff]   ;;  %v2001_v7 = vld [vmem:[%s2861_s5 + $0x18] sm:$0xff]  }
 0x13c   :  { %1840 = vmatprep.subr.bf16.mxu0 %v1999_v3 }
 0x13d   :  { %v337_v14 = vadd.f32 %v336_v9, %v317_v10  ;;  %v338_v15 = vadd.f32 %v336_v9, %v318_v11  ;;  %v339_v18 = vadd.f32 %v336_v9, %v319_v13  ;;  %v340_v21 = vadd.f32 %v336_v9, %v320_v17  ;;  %v2003_v10 = vld [vmem:[%s2861_s5 + $0x8] sm:$0xff]   ;;  %v2004_v11 = vld [vmem:[%s2861_s5] sm:$0xff]  }
 0x13e   :  { %v341_v23 = vadd.f32 %v336_v9, %v321_v19  ;;  %v342_v34 = vadd.f32 %v336_v9, %v322_v22  ;;  %v343_v33 = vadd.f32 %v336_v9, %v323_v24  ;;  %v344_v35 = vadd.f32 %v336_v9, %v324_v36  ;;  %v2007_v19 = vld [vmem:[#allocation2 + $0x28] sm:$0xff]  }
 0x13f   :  { %2031 = vtanh.f32 %v337_v14  ;;  %v345_v44 = vadd.f32 %v336_v9, %v325_v25  ;;  %v346_v27 = vadd.f32 %v336_v9, %v326_v26  ;;  %v347_v28 = vadd.f32 %v336_v9, %v327_v52  ;;  %1841 = vmatpush3.bf16.msra.mxu0 %v1999_v3  ;;  %v2005_v14 = vld [vmem:[#allocation2 + $0x38] sm:$0xff]  }
 0x140   :  { %2033 = vtanh.f32 %v338_v15  ;;  %v348_v48 = vadd.f32 %v336_v9, %v328_v40  ;;  %v351_v30 = vadd.f32 %v336_v9, %v331_v29  ;;  %v352_v4 = vadd.f32 %v336_v9, %v332_v60  ;;  %1842 = vmatprep.subr.bf16.mxu0 %v2000_v5  ;;  %v2006_v15 = vld [vmem:[#allocation2 + $0x30] sm:$0xff]   ;;  %1868 = vmatprep.subr.bf16.mxu1 %v2005_v14  ;;  %v2009_v60 = vld [vmem:[#allocation2 + $0x18] sm:$0xff]  }
 0x141   :  { %2035 = vtanh.f32 %v339_v18  ;;  %v350_v0 = vadd.f32 %v336_v9, %v330_v31  ;;  %v349_v38 = vadd.f32 %v336_v9, %v329_v56  ;;  %v2002_v9 = vld [vmem:[%s2861_s5 + $0x10] sm:$0xff]  }
 0x142   :  { %2037 = vtanh.f32 %v340_v21 }
 0x143   :  { %2039 = vtanh.f32 %v341_v23  ;;  %1843 = vmatpush3.bf16.msra.mxu0 %v2000_v5 }
 0x144   :  { %2041 = vtanh.f32 %v342_v34  ;;  %1844 = vmatprep.subr.bf16.mxu0 %v2001_v7 }
 0x145   :  { %2043 = vtanh.f32 %v343_v33 }
 0x146   :  { %2045 = vtanh.f32 %v344_v35  ;;  %v2008_v35 = vld [vmem:[#allocation2 + $0x20] sm:$0xff]  }
 0x147   :  { %2047 = vtanh.f32 %v345_v44  ;;  %1845 = vmatpush3.bf16.msra.mxu0 %v2001_v7 }
 0x148   :  { %2049 = vtanh.f32 %v346_v27  ;;  %1846 = vmatprep.subr.bf16.mxu0 %v2002_v9 }
 0x149   :  { %2051 = vtanh.f32 %v347_v28 }
 0x14a   :  { %2053 = vtanh.f32 %v348_v48 }
 0x14b   :  { %2055 = vtanh.f32 %v351_v30  ;;  %1847 = vmatpush3.bf16.msra.mxu0 %v2002_v9 }
 0x14c   :  { %v2032_v32 = vpop.eup %2031  ;;  %2057 = vtanh.f32 %v352_v4  ;;  %1848 = vmatprep.subr.bf16.mxu0 %v2003_v10 }
 0x14d   :  { %v2034_v37 = vpop.eup %2033  ;;  %2059 = vtanh.f32 %v350_v0 }
 0x14e   :  { %v2036_v39 = vpop.eup %2035  ;;  %v386_v8 = vpack.c.bf16 %v2034_v37, %v2032_v32  ;;  %2061 = vtanh.f32 %v349_v38 }
 0x14f   :  { %v2038_v41 = vpop.eup %2037  ;;  %1849 = vmatpush3.bf16.msra.mxu0 %v2003_v10 }
 0x150   :  { %v2040_v42 = vpop.eup %2039  ;;  %1820 = vmatprep.mubr.bf16.mxu1 %v386_v8  ;;  %v387_v16 = vpack.c.bf16 %v2038_v41, %v2036_v39  ;;  %1850 = vmatprep.subr.bf16.mxu0 %v2004_v11  ;;  %v2010_v39 = vld [vmem:[#allocation2 + $0x10] sm:$0xff]  }
 0x151   :  { %v2042_v43 = vpop.eup %2041 }
 0x152   :  { %v2044_v45 = vpop.eup %2043  ;;  %1821 = vmatmul.mubr.bf16.vlgmr.msra.gmra.mxu1 %v387_v16  ;;  %v388_v20 = vpack.c.bf16 %v2042_v43, %v2040_v42 }
 0x153   :  { %v2046_v46 = vpop.eup %2045  ;;  %1851 = vmatpush3.bf16.msra.mxu0 %v2004_v11  ;;  %1869 = vmatpush3.bf16.msra.mxu1 %v2005_v14 }
 0x154   :  { %v2048_v12 = vpop.eup %2047  ;;  %1824 = vmatprep.mubr.bf16.mxu1 %v388_v20  ;;  %v389_v53 = vpack.c.bf16 %v2046_v46, %v2044_v45  ;;  %1870 = vmatprep.subr.bf16.mxu1 %v2006_v15 }
 0x155   :  { %v2050_v47 = vpop.eup %2049 }
 0x156   :  { %v2052_v49 = vpop.eup %2051  ;;  %v390_v50 = vpack.c.bf16 %v2050_v47, %v2048_v12 }
 0x157   :  { %v2054_v51 = vpop.eup %2053  ;;  %1871 = vmatpush3.bf16.msra.mxu1 %v2006_v15 }
 0x158   :  { %v391_v54 = vpack.c.bf16 %v2054_v51, %v2052_v49  ;;  %v2056_v55 = vpop.eup %2055  ;;  %1872 = vmatprep.subr.bf16.mxu1 %v2007_v19 }
 0x159   :  { %v2058_v57 = vpop.eup %2057 }
 0x15a   :  { %1825 = vmatmul.mubr.bf16.gmra.mxu1 %v389_v53  ;;  %v393_v58 = vpack.c.bf16 %v2058_v57, %v2056_v55  ;;  %v2060_v59 = vpop.eup %2059 }
 0x15b   :  { %1828 = vmatprep.mubr.bf16.mxu1 %v390_v50  ;;  %v2062_v61 = vpop.eup %2061  ;;  %1873 = vmatpush3.bf16.msra.mxu1 %v2007_v19 }
 0x15c   :  { %v392_v62 = vpack.c.bf16 %v2060_v59, %v2062_v61  ;;  %1874 = vmatprep.subr.bf16.mxu1 %v2008_v35 }
 0x15f   :  { %1875 = vmatpush3.bf16.msra.mxu1 %v2008_v35 }
 0x160   :  { %1876 = vmatprep.subr.bf16.mxu1 %v2009_v60 }
 0x162   :  { %1829 = vmatmul.mubr.bf16.gmra.mxu1 %v391_v54 }
 0x163   :  { %1832 = vmatprep.mubr.bf16.mxu1 %v392_v62  ;;  %1877 = vmatpush3.bf16.msra.mxu1 %v2009_v60 }
 0x164   :  { %1878 = vmatprep.subr.bf16.mxu1 %v2010_v39 }
 0x167   :  { %1879 = vmatpush3.bf16.msra.mxu1 %v2010_v39 }
 0x16a   :  { %1833 = vmatmul.mubr.bf16.gmra.mxu1 %v393_v58 }
 0x212   :  { %v2550_v13 = vpop.f32.mrf.mxu1 }
 0x213   :  { %v562_v36 = vmul.f32 %v2550_v13, %v2550_v13 }
 0x214   :  { %v2552_v17 = vpop.f32.mrf.mxu1 }
 0x215   :  { %v560_v22 = vmul.f32 %v2552_v17, %v2552_v17 }
 0x216   :  { %v2554_v18 = vpop.f32.mrf.mxu1 }
 0x217   :  { %v563_v44 = vmul.f32 %v2554_v18, %v2554_v18 }
 0x218   :  { %v2556_v21 = vpop.f32.mrf.mxu1 }
 0x219   :  { %v539_v23 = vadd.f32 %v2556_v21, %v2552_v17  ;;  %v561_v24 = vmul.f32 %v2556_v21, %v2556_v21 }
 0x21a   :  { %v2564_v34 = vpop.f32.mrf.mxu1 }
 0x21b   :  { %v540_v33 = vadd.f32 %v2550_v13, %v539_v23  ;;  %v576_v25 = vadd.f32 %v561_v24, %v560_v22  ;;  %v566_v0 = vmul.f32 %v2564_v34, %v2564_v34 }
 0x21c   :  { %v2569_v26 = vpop.f32.mrf.mxu1 }
 0x21d   :  { %v577_v52 = vadd.f32 %v576_v25, %v562_v36  ;;  %v541_v27 = vadd.f32 %v2554_v18, %v540_v33  ;;  %v564_v48 = vmul.f32 %v2569_v26, %v2569_v26 }
 0x21e   :  { %v2574_v40 = vpop.f32.mrf.mxu1 }
 0x21f   :  { %v542_v28 = vadd.f32 %v541_v27, %v2569_v26  ;;  %v578_v29 = vadd.f32 %v577_v52, %v563_v44  ;;  %v567_v41 = vmul.f32 %v2574_v40, %v2574_v40 }
 0x220   :  { %v2579_v30 = vpop.f32.mrf.mxu1 }
 0x221   :  { %v579_v4 = vadd.f32 %v578_v29, %v564_v48  ;;  %v543_v31 = vadd.f32 %v542_v28, %v2579_v30  ;;  %v565_v56 = vmul.f32 %v2579_v30, %v2579_v30 }
 0x222   :  { %v2584_v32 = vpop.f32.mrf.mxu1 }
 0x223   :  { %v544_v37 = vadd.f32 %v2564_v34, %v543_v31  ;;  %v580_v38 = vadd.f32 %v579_v4, %v565_v56  ;;  %v570_v53 = vmul.f32 %v2584_v32, %v2584_v32 }
 0x224   :  { %v2589_v8 = vpop.f32.mrf.mxu1 }
 0x225   :  { %v581_v42 = vadd.f32 %v580_v38, %v566_v0  ;;  %v545_v16 = vadd.f32 %v2574_v40, %v544_v37  ;;  %v568_v20 = vmul.f32 %v2589_v8, %v2589_v8 }
 0x226   :  { %v2594_v43 = vpop.f32.mrf.mxu1 }
 0x227   :  { %v546_v45 = vadd.f32 %v545_v16, %v2589_v8  ;;  %v582_v46 = vadd.f32 %v581_v42, %v567_v41  ;;  %v571_v58 = vmul.f32 %v2594_v43, %v2594_v43  ;;  %v385_v41 = vld [vmem:[%s2860_s4] sm:$0x3] }
 0x228   :  { %v2599_v12 = vpop.f32.mrf.mxu1 }
 0x229   :  { %v583_v47 = vadd.f32 %v582_v46, %v568_v20  ;;  %v547_v49 = vadd.f32 %v546_v45, %v2599_v12  ;;  %v569_v50 = vmul.f32 %v2599_v12, %v2599_v12 }
 0x22a   :  { %v2604_v51 = vpop.f32.mrf.mxu1 }
 0x22b   :  { %v548_v54 = vadd.f32 %v2584_v32, %v547_v49  ;;  %v584_v55 = vadd.f32 %v583_v47, %v569_v50  ;;  %v574_v11 = vmul.f32 %v2604_v51, %v2604_v51 }
 0x22c   :  { %v2609_v57 = vpop.f32.mrf.mxu1 }
 0x22d   :  { %v585_v59 = vadd.f32 %v584_v55, %v570_v53  ;;  %v549_v61 = vadd.f32 %v2594_v43, %v548_v54  ;;  %v572_v2 = vmul.f32 %v2609_v57, %v2609_v57 }
 0x22e   :  { %v2614_v62 = vpop.f32.mrf.mxu1 }
 0x22f   :  { %v550_v63 = vadd.f32 %v549_v61, %v2609_v57  ;;  %v586_v3 = vadd.f32 %v585_v59, %v571_v58  ;;  %v575_v19 = vmul.f32 %v2614_v62, %v2614_v62 }
 0x230   :  { %v2619_v5 = vpop.f32.mrf.mxu1 }
 0x231   :  { %v587_v7 = vadd.f32 %v586_v3, %v572_v2  ;;  %v551_v9 = vadd.f32 %v550_v63, %v2619_v5  ;;  %v573_v10 = vmul.f32 %v2619_v5, %v2619_v5 }
 0x233   :  { %v552_v14 = vadd.f32 %v2604_v51, %v551_v9  ;;  %v588_v15 = vadd.f32 %v587_v7, %v573_v10 }
 0x235   :  { %v553_v22 = vadd.f32 %v2614_v62, %v552_v14  ;;  %v589_v23 = vadd.f32 %v588_v15, %v574_v11 }
 0x237   :  { %v554_v24 = vrot.slane %v553_v22, 4  ;;  %v590_v36 = vadd.f32 %v589_v23, %v575_v19 }
 0x239   :  { %v555_v33 = vadd.f32 %v554_v24, %v553_v22  ;;  %v591_v25 = vrot.slane %v590_v36, 4 }
 0x23b   :  { %v556_v35 = vrot.slane %v555_v33, 2  ;;  %v592_v44 = vadd.f32 %v591_v25, %v590_v36 }
 0x23d   :  { %v557_v52 = vadd.f32 %v556_v35, %v555_v33  ;;  %v593_v27 = vrot.slane %v592_v44, 2 }
 0x23f   :  { %v558_v28 = vrot.slane %v557_v52, 1  ;;  %v594_v48 = vadd.f32 %v593_v27, %v592_v44 }
 0x241   :  { %v559_v29 = vadd.f32 %v558_v28, %v557_v52  ;;  %v595_v60 = vrot.slane %v594_v48, 1 }
 0x243   :  { %v596_v4 = vadd.f32 %v595_v60, %v594_v48  ;;  %v597_v31 = vmul.f32 0.0078125, %v559_v29 }
 0x245   :  { %v598_v56 = vmul.f32 0.0078125, %v596_v4  ;;  %v599_v0 = vmul.f32 %v597_v31, %v597_v31 }
 0x247   :  { %v600_v37 = vsub.f32 %v598_v56, %v599_v0 }
 0x249   :  { %v601_v38 = vmax.f32 %v600_v37, 0.0 }
 0x24b   :  { %v602_v39 = vadd.f32 1e-05, %v601_v38 }
 0x24d   :  { %2063 = vrsqrt.f32 %v602_v39 }
 0x25a   :  { %v2064_v42 = vpop.eup %2063 }
 0x25b   :  { %v604_v16 = vmul.f32 %v2064_v42, %v385_v41 }
 0x25d   :  { %v605_v45 = vmul.f32 %v604_v16, %v597_v31  ;;  %v613_v46 = vrot.slane %v604_v16, %v2504_v1  ;;  %v2011_v16 = vld [vmem:[#allocation2 + $0x8] sm:$0xff]  }
 0x25e   :  { %1880 = vmatprep.subr.bf16.mxu1 %v2011_v16 }
 0x25f   :  { %v607_v20 = vrot.slane %v605_v45, 7  ;;  %v614_v50 = vmul.f32 %v613_v46, %v2552_v17  ;;  %v615_v53 = vmul.f32 %v613_v46, %v2556_v21  ;;  %v616_v54 = vmul.f32 %v2550_v13, %v613_v46  ;;  %1881 = vmatpush3.bf16.msra.mxu1 %v2011_v16  ;;  %v2012_v45 = vld [vmem:[#allocation2] sm:$0xff]  }
 0x260   :  { %v617_v59 = vmul.f32 %v2554_v18, %v613_v46  ;;  %v618_v63 = vmul.f32 %v613_v46, %v2569_v26  ;;  %v619_v3 = vmul.f32 %v613_v46, %v2579_v30  ;;  %v620_v9 = vmul.f32 %v2564_v34, %v613_v46  ;;  %1882 = vmatprep.subr.bf16.mxu1 %v2012_v45 }
 0x261   :  { %v609_v47 = vsub.f32 %v385_v41, %v607_v20  ;;  %v621_v21 = vmul.f32 %v2574_v40, %v613_v46  ;;  %v622_v10 = vmul.f32 %v613_v46, %v2589_v8  ;;  %v623_v11 = vmul.f32 %v613_v46, %v2599_v12 }
 0x262   :  { %v624_v30 = vmul.f32 %v2584_v32, %v613_v46  ;;  %v625_v34 = vmul.f32 %v2594_v43, %v613_v46  ;;  %v628_v19 = vmul.f32 %v2604_v51, %v613_v46  ;;  %v629_v8 = vmul.f32 %v2614_v62, %v613_v46 }
 0x263   :  { %v633_v49 = vrot.slane %v609_v47, %v2507_v6  ;;  %v627_v23 = vmul.f32 %v613_v46, %v2619_v5  ;;  %v626_v32 = vmul.f32 %v613_v46, %v2609_v57  ;;  %1883 = vmatpush3.bf16.msra.mxu1 %v2012_v45 }
 0x265   :  { %v634_v55 = vadd.f32 %v633_v49, %v614_v50  ;;  %v635_v58 = vadd.f32 %v633_v49, %v615_v53  ;;  %v636_v61 = vadd.f32 %v633_v49, %v616_v54  ;;  %v637_v2 = vadd.f32 %v633_v49, %v617_v59 }
 0x266   :  { %v638_v7 = vadd.f32 %v633_v49, %v618_v63  ;;  %v639_v17 = vadd.f32 %v633_v49, %v619_v3  ;;  %v640_v13 = vadd.f32 %v633_v49, %v620_v9  ;;  %v641_v18 = vadd.f32 %v633_v49, %v621_v21 }
 0x267   :  { %2065 = vtanh.f32 %v634_v55  ;;  %v642_v26 = vadd.f32 %v633_v49, %v622_v10  ;;  %v643_v14 = vadd.f32 %v633_v49, %v623_v11  ;;  %v644_v15 = vadd.f32 %v633_v49, %v624_v30 }
 0x268   :  { %2067 = vtanh.f32 %v635_v58  ;;  %v645_v40 = vadd.f32 %v633_v49, %v625_v34  ;;  %v648_v22 = vadd.f32 %v633_v49, %v628_v19  ;;  %v649_v12 = vadd.f32 %v633_v49, %v629_v8 }
 0x269   :  { %2069 = vtanh.f32 %v636_v61  ;;  %v647_v43 = vadd.f32 %v633_v49, %v627_v23  ;;  %v646_v33 = vadd.f32 %v633_v49, %v626_v32  ;;  %v1663_v49 = vld [vmem:[%s2862_s6] ss:$0 sm:$0xff] }
 0x26a   :  { %2071 = vtanh.f32 %v637_v2 }
 0x26b   :  { %2073 = vtanh.f32 %v638_v7 }
 0x26c   :  { %2075 = vtanh.f32 %v639_v17 }
 0x26d   :  { %2077 = vtanh.f32 %v640_v13 }
 0x26e   :  { %2079 = vtanh.f32 %v641_v18 }
 0x26f   :  { %2081 = vtanh.f32 %v642_v26 }
 0x270   :  { %2083 = vtanh.f32 %v643_v14 }
 0x271   :  { %2085 = vtanh.f32 %v644_v15 }
 0x272   :  { %2087 = vtanh.f32 %v645_v40 }
 0x273   :  { %2089 = vtanh.f32 %v648_v22 }
 0x274   :  { %v2066_v24 = vpop.eup %2065  ;;  %2091 = vtanh.f32 %v649_v12 }
 0x275   :  { %v2068_v36 = vpop.eup %2067  ;;  %2093 = vtanh.f32 %v647_v43 }
 0x276   :  { %v2070_v25 = vpop.eup %2069  ;;  %v683_v51 = vpack.c.bf16 %v2068_v36, %v2066_v24  ;;  %2095 = vtanh.f32 %v646_v33 }
 0x277   :  { %v2072_v35 = vpop.eup %2071 }
 0x278   :  { %v2074_v44 = vpop.eup %2073  ;;  %1852 = vmatprep.mubr.bf16.mxu0 %v683_v51  ;;  %v684_v62 = vpack.c.bf16 %v2072_v35, %v2070_v25 }
 0x279   :  { %v2076_v52 = vpop.eup %2075 }
 0x27a   :  { %v2078_v27 = vpop.eup %2077  ;;  %1853 = vmatmul.mubr.bf16.vlgmr.msra.gmra.mxu0 %v684_v62  ;;  %v685_v5 = vpack.c.bf16 %v2076_v52, %v2074_v44  ;;  %v2013_v44 = vld [vmem:[#allocation5 + $0x38] sm:$0xff]   ;;  %v2014_v62 = vld [vmem:[#allocation5 + $0x30] sm:$0xff]   ;;  %v2015_v52 = vld [vmem:[#allocation5 + $0x28] sm:$0xff]  }
 0x27b   :  { %v2080_v28 = vpop.eup %2079  ;;  %1900 = vmatprep.subr.bf16.mxu0 %v2013_v44 }
 0x27c   :  { %v2082_v57 = vpop.eup %2081  ;;  %1856 = vmatprep.mubr.bf16.mxu0 %v685_v5  ;;  %v686_v31 = vpack.c.bf16 %v2080_v28, %v2078_v27  ;;  %1901 = vmatpush3.bf16.msra.mxu0 %v2013_v44  ;;  %v2016_v27 = vld [vmem:[#allocation5 + $0x20] sm:$0xff]   ;;  %v2017_v5 = vld [vmem:[#allocation5 + $0x18] sm:$0xff]   ;;  %v2018_v28 = vld [vmem:[#allocation5 + $0x10] sm:$0xff]  }
 0x27d   :  { %v2084_v48 = vpop.eup %2083  ;;  %1902 = vmatprep.subr.bf16.mxu0 %v2014_v62 }
 0x27e   :  { %v2086_v29 = vpop.eup %2085  ;;  %v687_v60 = vpack.c.bf16 %v2084_v48, %v2082_v57  ;;  %v2019_v57 = vld [vmem:[#allocation5 + $0x8] sm:$0xff]   ;;  %v2020_v48 = vld [vmem:[#allocation5] sm:$0xff]  }
 0x27f   :  { %v2088_v4 = vpop.eup %2087 }
 0x280   :  { %v688_v56 = vpack.c.bf16 %v2088_v4, %v2086_v29  ;;  %v2090_v0 = vpop.eup %2089  ;;  %1903 = vmatpush3.bf16.msra.mxu0 %v2014_v62 }
 0x281   :  { %v2092_v37 = vpop.eup %2091  ;;  %1904 = vmatprep.subr.bf16.mxu0 %v2015_v52 }
 0x282   :  { %1857 = vmatmul.mubr.bf16.gmra.mxu0 %v686_v31  ;;  %v690_v38 = vpack.c.bf16 %v2092_v37, %v2090_v0  ;;  %v2094_v39 = vpop.eup %2093 }
 0x283   :  { %1860 = vmatprep.mubr.bf16.mxu0 %v687_v60  ;;  %v2096_v41 = vpop.eup %2095 }
 0x284   :  { %v689_v42 = vpack.c.bf16 %v2094_v39, %v2096_v41  ;;  %1905 = vmatpush3.bf16.msra.mxu0 %v2015_v52 }
 0x285   :  { %1906 = vmatprep.subr.bf16.mxu0 %v2016_v27 }
 0x288   :  { %1907 = vmatpush3.bf16.msra.mxu0 %v2016_v27 }
 0x289   :  { %1908 = vmatprep.subr.bf16.mxu0 %v2017_v5 }
 0x28a   :  { %1861 = vmatmul.mubr.bf16.gmra.mxu0 %v688_v56 }
 0x28b   :  { %1864 = vmatprep.mubr.bf16.mxu0 %v689_v42 }
 0x28c   :  { %1909 = vmatpush3.bf16.msra.mxu0 %v2017_v5 }
 0x28d   :  { %1910 = vmatprep.subr.bf16.mxu0 %v2018_v28 }
 0x290   :  { %1911 = vmatpush3.bf16.msra.mxu0 %v2018_v28 }
 0x291   :  { %1912 = vmatprep.subr.bf16.mxu0 %v2019_v57 }
 0x292   :  { %1865 = vmatmul.mubr.bf16.gmra.mxu0 %v690_v38 }
 0x294   :  { %1913 = vmatpush3.bf16.msra.mxu0 %v2019_v57 }
 0x295   :  { %1914 = vmatprep.subr.bf16.mxu0 %v2020_v48 }
 0x298   :  { %1915 = vmatpush3.bf16.msra.mxu0 %v2020_v48 }
 0x33a   :  { %v1854_v20 = vpop.f32.mrf.mxu0 }
 0x33b   :  { %v788_v58 = vadd.f32 %v1854_v20, %v1663_v49 }
 0x33c   :  { %v779_v46 = vpop.f32.mrf.mxu0 }
 0x33d   :  { %v780_v54 = vadd.f32 %v1663_v49, %v779_v46 }
 0x33e   :  { %v1855_v47 = vpop.f32.mrf.mxu0 }
 0x33f   :  { %v791_v50 = vadd.f32 %v1855_v47, %v1663_v49 }
 0x340   :  { %v782_v53 = vpop.f32.mrf.mxu0 }
 0x341   :  { %v783_v55 = vadd.f32 %v1663_v49, %v782_v53  ;;  %v860_v63 = vpack.c.bf16 %v791_v50, %v788_v58 }
 0x342   :  { %v1858_v59 = vpop.f32.mrf.mxu0 }
 0x343   :  { %v859_v61 = vpack.c.bf16 %v783_v55, %v780_v54  ;;  %v804_v13 = vadd.f32 %v1858_v59, %v1663_v49 }
 0x344   :  { %v795_v2 = vpop.f32.mrf.mxu0 }
 0x345   :  { %1884 = vmatprep.mubr.bf16.mxu1 %v859_v61  ;;  %v796_v17 = vadd.f32 %v1663_v49, %v795_v2 }
 0x346   :  { %v1859_v3 = vpop.f32.mrf.mxu0  ;;  %1885 = vmatmul.mubr.bf16.vlgmr.msra.gmra.mxu1 %v860_v63 }
 0x347   :  { %v807_v7 = vadd.f32 %v1859_v3, %v1663_v49 }
 0x348   :  { %v798_v9 = vpop.f32.mrf.mxu0 }
 0x349   :  { %v799_v21 = vadd.f32 %v1663_v49, %v798_v9  ;;  %v862_v11 = vpack.c.bf16 %v807_v7, %v804_v13 }
 0x34a   :  { %v1862_v10 = vpop.f32.mrf.mxu0 }
 0x34b   :  { %v861_v18 = vpack.c.bf16 %v799_v21, %v796_v17  ;;  %v820_v19 = vadd.f32 %v1862_v10, %v1663_v49 }
 0x34c   :  { %v811_v26 = vpop.f32.mrf.mxu0 }
 0x34d   :  { %1888 = vmatprep.mubr.bf16.mxu1 %v861_v18  ;;  %v812_v15 = vadd.f32 %v1663_v49, %v811_v26 }
 0x34e   :  { %v1863_v30 = vpop.f32.mrf.mxu0  ;;  %1889 = vmatmul.mubr.bf16.gmra.mxu1 %v862_v11 }
 0x34f   :  { %v823_v14 = vadd.f32 %v1863_v30, %v1663_v49 }
 0x350   :  { %v814_v34 = vpop.f32.mrf.mxu0 }
 0x351   :  { %v815_v40 = vadd.f32 %v1663_v49, %v814_v34  ;;  %v864_v12 = vpack.c.bf16 %v823_v14, %v820_v19 }
 0x352   :  { %v1866_v8 = vpop.f32.mrf.mxu0 }
 0x353   :  { %v863_v22 = vpack.c.bf16 %v815_v40, %v812_v15  ;;  %v836_v25 = vadd.f32 %v1866_v8, %v1663_v49 }
 0x354   :  { %v827_v23 = vpop.f32.mrf.mxu0 }
 0x355   :  { %1892 = vmatprep.mubr.bf16.mxu1 %v863_v22  ;;  %v828_v36 = vadd.f32 %v1663_v49, %v827_v23 }
 0x356   :  { %v1867_v32 = vpop.f32.mrf.mxu0  ;;  %1893 = vmatmul.mubr.bf16.gmra.mxu1 %v864_v12 }
 0x357   :  { %v839_v24 = vadd.f32 %v1867_v32, %v1663_v49 }
 0x358   :  { %v830_v43 = vpop.f32.mrf.mxu0 }
 0x359   :  { %v831_v33 = vadd.f32 %v1663_v49, %v830_v43  ;;  %v866_v35 = vpack.c.bf16 %v839_v24, %v836_v25 }
 0x35b   :  { %v865_v51 = vpack.c.bf16 %v831_v33, %v828_v36 }
 0x35d   :  { %1896 = vmatprep.mubr.bf16.mxu1 %v865_v51 }
 0x35e   :  { %1897 = vmatmul.mubr.bf16.gmra.mxu1 %v866_v35 }
 0x406   :  { %v2654_v29 = vpop.f32.mrf.mxu1 }
 0x407   :  { %v1035_v39 = vmul.f32 %v2654_v29, %v2654_v29 }
 0x408   :  { %v2656_v60 = vpop.f32.mrf.mxu1 }
 0x409   :  { %v1033_v56 = vmul.f32 %v2656_v60, %v2656_v60 }
 0x40a   :  { %v2658_v4 = vpop.f32.mrf.mxu1 }
 0x40b   :  { %v1036_v45 = vmul.f32 %v2658_v4, %v2658_v4 }
 0x40c   :  { %v2660_v31 = vpop.f32.mrf.mxu1 }
 0x40d   :  { %v1012_v0 = vadd.f32 %v2660_v31, %v2656_v60  ;;  %v1034_v37 = vmul.f32 %v2660_v31, %v2660_v31 }
 0x40e   :  { %v2668_v38 = vpop.f32.mrf.mxu1 }
 0x40f   :  { %v1013_v41 = vadd.f32 %v2654_v29, %v1012_v0  ;;  %v1049_v42 = vadd.f32 %v1034_v37, %v1033_v56  ;;  %v1039_v63 = vmul.f32 %v2668_v38, %v2668_v38 }
 0x410   :  { %v2673_v16 = vpop.f32.mrf.mxu1 }
 0x411   :  { %v1050_v20 = vadd.f32 %v1049_v42, %v1035_v39  ;;  %v1014_v46 = vadd.f32 %v2658_v4, %v1013_v41  ;;  %v1037_v50 = vmul.f32 %v2673_v16, %v2673_v16 }
 0x412   :  { %v2678_v47 = vpop.f32.mrf.mxu1 }
 0x413   :  { %v1015_v49 = vadd.f32 %v1014_v46, %v2673_v16  ;;  %v1051_v53 = vadd.f32 %v1050_v20, %v1036_v45  ;;  %v1040_v9 = vmul.f32 %v2678_v47, %v2678_v47 }
 0x414   :  { %v2683_v54 = vpop.f32.mrf.mxu1 }
 0x415   :  { %v1052_v55 = vadd.f32 %v1051_v53, %v1037_v50  ;;  %v1016_v58 = vadd.f32 %v1015_v49, %v2683_v54  ;;  %v1038_v59 = vmul.f32 %v2683_v54, %v2683_v54 }
 0x416   :  { %v2688_v61 = vpop.f32.mrf.mxu1 }
 0x417   :  { %v1017_v2 = vadd.f32 %v2668_v38, %v1016_v58  ;;  %v1053_v3 = vadd.f32 %v1052_v55, %v1038_v59  ;;  %v1043_v40 = vmul.f32 %v2688_v61, %v2688_v61 }
 0x418   :  { %v2693_v7 = vpop.f32.mrf.mxu1 }
 0x419   :  { %v1054_v17 = vadd.f32 %v1053_v3, %v1039_v63  ;;  %v1018_v21 = vadd.f32 %v2678_v47, %v1017_v2  ;;  %v1041_v18 = vmul.f32 %v2693_v7, %v2693_v7 }
 0x41a   :  { %v2698_v13 = vpop.f32.mrf.mxu1 }
 0x41b   :  { %v1019_v10 = vadd.f32 %v1018_v21, %v2693_v7  ;;  %v1055_v11 = vadd.f32 %v1054_v17, %v1040_v9  ;;  %v1044_v12 = vmul.f32 %v2698_v13, %v2698_v13  ;;  %v858_v9 = vld [vmem:[%s2864_s8] sm:$0x3] }
 0x41c   :  { %v2703_v26 = vpop.f32.mrf.mxu1 }
 0x41d   :  { %v1056_v30 = vadd.f32 %v1055_v11, %v1041_v18  ;;  %v1020_v14 = vadd.f32 %v1019_v10, %v2703_v26  ;;  %v1042_v34 = vmul.f32 %v2703_v26, %v2703_v26 }
 0x41e   :  { %v2708_v15 = vpop.f32.mrf.mxu1 }
 0x41f   :  { %v1021_v19 = vadd.f32 %v2688_v61, %v1020_v14  ;;  %v1057_v8 = vadd.f32 %v1056_v30, %v1042_v34  ;;  %v1047_v62 = vmul.f32 %v2708_v15, %v2708_v15 }
 0x420   :  { %v2713_v22 = vpop.f32.mrf.mxu1 }
 0x421   :  { %v1058_v23 = vadd.f32 %v1057_v8, %v1043_v40  ;;  %v1022_v32 = vadd.f32 %v2698_v13, %v1021_v19  ;;  %v1045_v36 = vmul.f32 %v2713_v22, %v2713_v22 }
 0x422   :  { %v2718_v24 = vpop.f32.mrf.mxu1 }
 0x423   :  { %v1023_v43 = vadd.f32 %v1022_v32, %v2713_v22  ;;  %v1059_v33 = vadd.f32 %v1058_v23, %v1044_v12  ;;  %v1048_v5 = vmul.f32 %v2718_v24, %v2718_v24 }
 0x424   :  { %v2723_v25 = vpop.f32.mrf.mxu1 }
 0x425   :  { %v1060_v51 = vadd.f32 %v1059_v33, %v1045_v36  ;;  %v1024_v35 = vadd.f32 %v1023_v43, %v2723_v25  ;;  %v1046_v44 = vmul.f32 %v2723_v25, %v2723_v25 }
 0x427   :  { %v1025_v52 = vadd.f32 %v2708_v15, %v1024_v35  ;;  %v1061_v27 = vadd.f32 %v1060_v51, %v1046_v44 }
 0x429   :  { %v1026_v28 = vadd.f32 %v2718_v24, %v1025_v52  ;;  %v1062_v57 = vadd.f32 %v1061_v27, %v1047_v62 }
 0x42b   :  { %v1027_v48 = vrot.slane %v1026_v28, 4  ;;  %v1063_v56 = vadd.f32 %v1062_v57, %v1048_v5 }
 0x42d   :  { %v1028_v0 = vadd.f32 %v1027_v48, %v1026_v28  ;;  %v1064_v37 = vrot.slane %v1063_v56, 4 }
 0x42f   :  { %v1029_v39 = vrot.slane %v1028_v0, 2  ;;  %v1065_v41 = vadd.f32 %v1064_v37, %v1063_v56 }
 0x431   :  { %v1030_v42 = vadd.f32 %v1029_v39, %v1028_v0  ;;  %v1066_v45 = vrot.slane %v1065_v41, 2 }
 0x433   :  { %v1031_v20 = vrot.slane %v1030_v42, 1  ;;  %v1067_v46 = vadd.f32 %v1066_v45, %v1065_v41 }
 0x435   :  { %v1032_v49 = vadd.f32 %v1031_v20, %v1030_v42  ;;  %v1068_v50 = vrot.slane %v1067_v46, 1 }
 0x437   :  { %v1069_v53 = vadd.f32 %v1068_v50, %v1067_v46  ;;  %v1070_v55 = vmul.f32 0.0078125, %v1032_v49 }
 0x439   :  { %v1071_v58 = vmul.f32 0.0078125, %v1069_v53  ;;  %v1072_v59 = vmul.f32 %v1070_v55, %v1070_v55 }
 0x43b   :  { %v1073_v63 = vsub.f32 %v1071_v58, %v1072_v59 }
 0x43d   :  { %v1074_v2 = vmax.f32 %v1073_v63, 0.0 }
 0x43f   :  { %v1075_v3 = vadd.f32 1e-05, %v1074_v2 }
 0x441   :  { %2097 = vrsqrt.f32 %v1075_v3 }
 0x44e   :  { %v2098_v17 = vpop.eup %2097 }
 0x44f   :  { %v1077_v21 = vmul.f32 %v2098_v17, %v858_v9 }
 0x451   :  { %v1078_v10 = vmul.f32 %v1077_v21, %v1070_v55  ;;  %v1086_v11 = vrot.slane %v1077_v21, %v2504_v1  ;;  %v2021_v21 = vld [vmem:[#allocation7 + $0x38] sm:$0xff]  }
 0x452   :  { %1964 = vmatprep.subr.bf16.mxu1 %v2021_v21  ;;  %1932 = vmatprep.subr.bf16.mxu0 %v2021_v21 }
 0x453   :  { %v1080_v18 = vrot.slane %v1078_v10, 7  ;;  %v1087_v34 = vmul.f32 %v1086_v11, %v2656_v60  ;;  %v1088_v40 = vmul.f32 %v1086_v11, %v2660_v31  ;;  %v1089_v19 = vmul.f32 %v2654_v29, %v1086_v11  ;;  %1972 = vmatpush3.bf16.msra.mxu1 %v2021_v21  ;;  %v2022_v10 = vld [vmem:[#allocation7 + $0x30] sm:$0xff]  }
 0x454   :  { %v1090_v23 = vmul.f32 %v2658_v4, %v1086_v11  ;;  %v1091_v43 = vmul.f32 %v1086_v11, %v2673_v16  ;;  %v1092_v33 = vmul.f32 %v1086_v11, %v2683_v54  ;;  %v1093_v35 = vmul.f32 %v2668_v38, %v1086_v11  ;;  %1965 = vmatprep.subr.bf16.mxu1 %v2022_v10 }
 0x455   :  { %v1082_v30 = vsub.f32 %v858_v9, %v1080_v18  ;;  %v1094_v31 = vmul.f32 %v2678_v47, %v1086_v11  ;;  %v1095_v44 = vmul.f32 %v1086_v11, %v2693_v7  ;;  %v1096_v62 = vmul.f32 %v1086_v11, %v2703_v26  ;;  %v2023_v18 = vld [vmem:[#allocation7 + $0x28] sm:$0xff]  }
 0x456   :  { %v1097_v54 = vmul.f32 %v2688_v61, %v1086_v11  ;;  %v1098_v38 = vmul.f32 %v2698_v13, %v1086_v11  ;;  %v1101_v5 = vmul.f32 %v2708_v15, %v1086_v11  ;;  %v1102_v7 = vmul.f32 %v2718_v24, %v1086_v11 }
 0x457   :  { %v1106_v14 = vrot.slane %v1082_v30, %v2507_v6  ;;  %v1100_v57 = vmul.f32 %v1086_v11, %v2723_v25  ;;  %v1099_v61 = vmul.f32 %v1086_v11, %v2713_v22  ;;  %1973 = vmatpush3.bf16.msra.mxu1 %v2022_v10  ;;  %v2024_v11 = vld [vmem:[#allocation7 + $0x20] sm:$0xff]   ;;  %v2025_v30 = vld [vmem:[#allocation7 + $0x18] sm:$0xff]  }
 0x458   :  { %1966 = vmatprep.subr.bf16.mxu1 %v2023_v18 }
 0x459   :  { %v1107_v8 = vadd.f32 %v1106_v14, %v1087_v34  ;;  %v1108_v12 = vadd.f32 %v1106_v14, %v1088_v40  ;;  %v1109_v32 = vadd.f32 %v1106_v14, %v1089_v19  ;;  %v1110_v36 = vadd.f32 %v1106_v14, %v1090_v23  ;;  %v2027_v34 = vld [vmem:[#allocation7 + $0x8] sm:$0xff]   ;;  %v2028_v40 = vld [vmem:[#allocation7] sm:$0xff]  }
 0x45a   :  { %v1111_v51 = vadd.f32 %v1106_v14, %v1091_v43  ;;  %v1112_v60 = vadd.f32 %v1106_v14, %v1092_v33  ;;  %v1113_v29 = vadd.f32 %v1106_v14, %v1093_v35  ;;  %v1114_v4 = vadd.f32 %v1106_v14, %v1094_v31 }
 0x45b   :  { %2099 = vtanh.f32 %v1107_v8  ;;  %v1115_v16 = vadd.f32 %v1106_v14, %v1095_v44  ;;  %v1116_v52 = vadd.f32 %v1106_v14, %v1096_v62  ;;  %v1117_v27 = vadd.f32 %v1106_v14, %v1097_v54  ;;  %1974 = vmatpush3.bf16.msra.mxu1 %v2023_v18 }
 0x45c   :  { %2101 = vtanh.f32 %v1108_v12  ;;  %v1118_v47 = vadd.f32 %v1106_v14, %v1098_v38  ;;  %v1121_v28 = vadd.f32 %v1106_v14, %v1101_v5  ;;  %v1122_v26 = vadd.f32 %v1106_v14, %v1102_v7  ;;  %1967 = vmatprep.subr.bf16.mxu1 %v2024_v11 }
 0x45d   :  { %2103 = vtanh.f32 %v1109_v32  ;;  %v1120_v13 = vadd.f32 %v1106_v14, %v1100_v57  ;;  %v1119_v0 = vadd.f32 %v1106_v14, %v1099_v61  ;;  %v2026_v14 = vld [vmem:[#allocation7 + $0x10] sm:$0xff]  }
 0x45e   :  { %2105 = vtanh.f32 %v1110_v36 }
 0x45f   :  { %2107 = vtanh.f32 %v1111_v51  ;;  %1975 = vmatpush3.bf16.msra.mxu1 %v2024_v11 }
 0x460   :  { %2109 = vtanh.f32 %v1112_v60  ;;  %1968 = vmatprep.subr.bf16.mxu1 %v2025_v30 }
 0x461   :  { %2111 = vtanh.f32 %v1113_v29 }
 0x462   :  { %2113 = vtanh.f32 %v1114_v4 }
 0x463   :  { %2115 = vtanh.f32 %v1115_v16  ;;  %1976 = vmatpush3.bf16.msra.mxu1 %v2025_v30 }
 0x464   :  { %2117 = vtanh.f32 %v1116_v52  ;;  %1969 = vmatprep.subr.bf16.mxu1 %v2026_v14 }
 0x465   :  { %2119 = vtanh.f32 %v1117_v27 }
 0x466   :  { %2121 = vtanh.f32 %v1118_v47 }
 0x467   :  { %2123 = vtanh.f32 %v1121_v28  ;;  %1977 = vmatpush3.bf16.msra.mxu1 %v2026_v14 }
 0x468   :  { %v2100_v48 = vpop.eup %2099  ;;  %2125 = vtanh.f32 %v1122_v26  ;;  %1970 = vmatprep.subr.bf16.mxu1 %v2027_v34 }
 0x469   :  { %v2102_v56 = vpop.eup %2101  ;;  %2127 = vtanh.f32 %v1120_v13 }
 0x46a   :  { %v2104_v37 = vpop.eup %2103  ;;  %v1156_v15 = vpack.c.bf16 %v2102_v56, %v2100_v48  ;;  %2129 = vtanh.f32 %v1119_v0 }
 0x46b   :  { %v2106_v39 = vpop.eup %2105  ;;  %1978 = vmatpush3.bf16.msra.mxu1 %v2027_v34 }
 0x46c   :  { %v2108_v41 = vpop.eup %2107  ;;  %1916 = vmatprep.mubr.bf16.mxu0 %v1156_v15  ;;  %v1157_v24 = vpack.c.bf16 %v2106_v39, %v2104_v37  ;;  %1971 = vmatprep.subr.bf16.mxu1 %v2028_v40 }
 0x46d   :  { %v2110_v42 = vpop.eup %2109 }
 0x46e   :  { %v2112_v45 = vpop.eup %2111  ;;  %1917 = vmatmul.mubr.bf16.vlgmr.msra.gmra.mxu0 %v1157_v24  ;;  %v1158_v25 = vpack.c.bf16 %v2110_v42, %v2108_v41 }
 0x46f   :  { %v2114_v20 = vpop.eup %2113  ;;  %1933 = vmatpush3.bf16.msra.mxu0 %v2021_v21  ;;  %1979 = vmatpush3.bf16.msra.mxu1 %v2028_v40 }
 0x470   :  { %v2116_v22 = vpop.eup %2115  ;;  %1920 = vmatprep.mubr.bf16.mxu0 %v1158_v25  ;;  %v1159_v55 = vpack.c.bf16 %v2114_v20, %v2112_v45  ;;  %1934 = vmatprep.subr.bf16.mxu0 %v2022_v10 }
 0x471   :  { %v2118_v46 = vpop.eup %2117 }
 0x472   :  { %v2120_v49 = vpop.eup %2119  ;;  %v1160_v50 = vpack.c.bf16 %v2118_v46, %v2116_v22 }
 0x473   :  { %v2122_v53 = vpop.eup %2121  ;;  %1935 = vmatpush3.bf16.msra.mxu0 %v2022_v10 }
 0x474   :  { %v1161_v58 = vpack.c.bf16 %v2122_v53, %v2120_v49  ;;  %v2124_v59 = vpop.eup %2123  ;;  %1936 = vmatprep.subr.bf16.mxu0 %v2023_v18 }
 0x475   :  { %v2126_v63 = vpop.eup %2125 }
 0x476   :  { %1921 = vmatmul.mubr.bf16.gmra.mxu0 %v1159_v55  ;;  %v1163_v2 = vpack.c.bf16 %v2126_v63, %v2124_v59  ;;  %v2128_v3 = vpop.eup %2127 }
 0x477   :  { %1924 = vmatprep.mubr.bf16.mxu0 %v1160_v50  ;;  %v2130_v9 = vpop.eup %2129  ;;  %1937 = vmatpush3.bf16.msra.mxu0 %v2023_v18 }
 0x478   :  { %v1162_v17 = vpack.c.bf16 %v2128_v3, %v2130_v9  ;;  %1938 = vmatprep.subr.bf16.mxu0 %v2024_v11 }
 0x47b   :  { %1939 = vmatpush3.bf16.msra.mxu0 %v2024_v11 }
 0x47c   :  { %1940 = vmatprep.subr.bf16.mxu0 %v2025_v30 }
 0x47e   :  { %1925 = vmatmul.mubr.bf16.gmra.mxu0 %v1161_v58 }
 0x47f   :  { %1928 = vmatprep.mubr.bf16.mxu0 %v1162_v17  ;;  %1941 = vmatpush3.bf16.msra.mxu0 %v2025_v30 }
 0x480   :  { %1942 = vmatprep.subr.bf16.mxu0 %v2026_v14 }
 0x483   :  { %1943 = vmatpush3.bf16.msra.mxu0 %v2026_v14 }
 0x484   :  { %1944 = vmatprep.subr.bf16.mxu0 %v2027_v34 }
 0x486   :  { %1929 = vmatmul.mubr.bf16.gmra.mxu0 %v1163_v2 }
 0x487   :  { %1945 = vmatpush3.bf16.msra.mxu0 %v2027_v34 }
 0x488   :  { %1946 = vmatprep.subr.bf16.mxu0 %v2028_v40 }
 0x48b   :  { %1947 = vmatpush3.bf16.msra.mxu0 %v2028_v40 }
 0x52e   :  { %v2755_v19 = vpop.f32.mrf.mxu0 }
 0x52f   :  { %v1332_v51 = vmul.f32 %v2755_v19, %v2755_v19 }
 0x530   :  { %v2757_v8 = vpop.f32.mrf.mxu0 }
 0x531   :  { %v1330_v32 = vmul.f32 %v2757_v8, %v2757_v8 }
 0x532   :  { %v2759_v12 = vpop.f32.mrf.mxu0 }
 0x533   :  { %v1333_v29 = vmul.f32 %v2759_v12, %v2759_v12 }
 0x534   :  { %v2761_v23 = vpop.f32.mrf.mxu0 }
 0x535   :  { %v1309_v43 = vadd.f32 %v2761_v23, %v2757_v8  ;;  %v1331_v36 = vmul.f32 %v2761_v23, %v2761_v23 }
 0x536   :  { %v2769_v33 = vpop.f32.mrf.mxu0 }
 0x537   :  { %v1310_v35 = vadd.f32 %v2755_v19, %v1309_v43  ;;  %v1346_v60 = vadd.f32 %v1331_v36, %v1330_v32  ;;  %v1336_v28 = vmul.f32 %v2769_v33, %v2769_v33 }
 0x538   :  { %v2774_v31 = vpop.f32.mrf.mxu0 }
 0x539   :  { %v1347_v44 = vadd.f32 %v1346_v60, %v1332_v51  ;;  %v1311_v4 = vadd.f32 %v2759_v12, %v1310_v35  ;;  %v1334_v54 = vmul.f32 %v2774_v31, %v2774_v31 }
 0x53a   :  { %v2779_v62 = vpop.f32.mrf.mxu0 }
 0x53b   :  { %v1312_v16 = vadd.f32 %v1311_v4, %v2774_v31  ;;  %v1348_v52 = vadd.f32 %v1347_v44, %v1333_v29  ;;  %v1337_v48 = vmul.f32 %v2779_v62, %v2779_v62 }
 0x53c   :  { %v2784_v38 = vpop.f32.mrf.mxu0 }
 0x53d   :  { %v1349_v27 = vadd.f32 %v1348_v52, %v1334_v54  ;;  %v1313_v47 = vadd.f32 %v1312_v16, %v2784_v38  ;;  %v1335_v5 = vmul.f32 %v2784_v38, %v2784_v38 }
 0x53e   :  { %v2789_v7 = vpop.f32.mrf.mxu0 }
 0x53f   :  { %v1314_v26 = vadd.f32 %v2769_v33, %v1313_v47  ;;  %v1350_v57 = vadd.f32 %v1349_v27, %v1335_v5  ;;  %v1340_v20 = vmul.f32 %v2789_v7, %v2789_v7 }
 0x540   :  { %v2794_v61 = vpop.f32.mrf.mxu0 }
 0x541   :  { %v1351_v13 = vadd.f32 %v1350_v57, %v1336_v28  ;;  %v1315_v56 = vadd.f32 %v2779_v62, %v1314_v26  ;;  %v1338_v15 = vmul.f32 %v2794_v61, %v2794_v61 }
 0x542   :  { %v2799_v0 = vpop.f32.mrf.mxu0 }
 0x543   :  { %v1316_v37 = vadd.f32 %v1315_v56, %v2794_v61  ;;  %v1352_v39 = vadd.f32 %v1351_v13, %v1337_v48  ;;  %v1341_v50 = vmul.f32 %v2799_v0, %v2799_v0  ;;  %v1155_v48 = vld [vmem:[%s2866_s10] sm:$0x3] }
 0x544   :  { %v2804_v41 = vpop.f32.mrf.mxu0 }
 0x545   :  { %v1353_v24 = vadd.f32 %v1352_v39, %v1338_v15  ;;  %v1317_v42 = vadd.f32 %v1316_v37, %v2804_v41  ;;  %v1339_v45 = vmul.f32 %v2804_v41, %v2804_v41 }
 0x546   :  { %v2809_v25 = vpop.f32.mrf.mxu0 }
 0x547   :  { %v1318_v22 = vadd.f32 %v2789_v7, %v1317_v42  ;;  %v1354_v46 = vadd.f32 %v1353_v24, %v1339_v45  ;;  %v1344_v10 = vmul.f32 %v2809_v25, %v2809_v25 }
 0x548   :  { %v2814_v49 = vpop.f32.mrf.mxu0 }
 0x549   :  { %v1355_v53 = vadd.f32 %v1354_v46, %v1340_v20  ;;  %v1319_v55 = vadd.f32 %v2799_v0, %v1318_v22  ;;  %v1342_v63 = vmul.f32 %v2814_v49, %v2814_v49 }
 0x54a   :  { %v2819_v58 = vpop.f32.mrf.mxu0 }
 0x54b   :  { %v1320_v59 = vadd.f32 %v1319_v55, %v2814_v49  ;;  %v1356_v2 = vadd.f32 %v1355_v53, %v1341_v50  ;;  %v1345_v30 = vmul.f32 %v2819_v58, %v2819_v58 }
 0x54c   :  { %v1297_v3 = vpop.f32.mrf.mxu0 }
 0x54d   :  { %v1357_v9 = vadd.f32 %v1356_v2, %v1342_v63  ;;  %v1321_v17 = vadd.f32 %v1320_v59, %v1297_v3  ;;  %v1343_v21 = vmul.f32 %v1297_v3, %v1297_v3 }
 0x54f   :  { %v1322_v18 = vadd.f32 %v2809_v25, %v1321_v17  ;;  %v1358_v11 = vadd.f32 %v1357_v9, %v1343_v21 }
 0x551   :  { %v1323_v14 = vadd.f32 %v2819_v58, %v1322_v18  ;;  %v1359_v34 = vadd.f32 %v1358_v11, %v1344_v10 }
 0x553   :  { %v1324_v40 = vrot.slane %v1323_v14, 4  ;;  %v1360_v32 = vadd.f32 %v1359_v34, %v1345_v30 }
 0x555   :  { %v1325_v43 = vadd.f32 %v1324_v40, %v1323_v14  ;;  %v1361_v36 = vrot.slane %v1360_v32, 4 }
 0x557   :  { %v1326_v51 = vrot.slane %v1325_v43, 2  ;;  %v1362_v35 = vadd.f32 %v1361_v36, %v1360_v32 }
 0x559   :  { %v1327_v60 = vadd.f32 %v1326_v51, %v1325_v43  ;;  %v1363_v29 = vrot.slane %v1362_v35, 2 }
 0x55b   :  { %v1328_v44 = vrot.slane %v1327_v60, 1  ;;  %v1364_v4 = vadd.f32 %v1363_v29, %v1362_v35 }
 0x55d   :  { %v1329_v16 = vadd.f32 %v1328_v44, %v1327_v60  ;;  %v1365_v54 = vrot.slane %v1364_v4, 1 }
 0x55f   :  { %v1366_v52 = vadd.f32 %v1365_v54, %v1364_v4  ;;  %v1367_v27 = vmul.f32 0.0078125, %v1329_v16 }
 0x561   :  { %v1368_v47 = vmul.f32 0.0078125, %v1366_v52  ;;  %v1369_v5 = vmul.f32 %v1367_v27, %v1367_v27 }
 0x563   :  { %v1370_v28 = vsub.f32 %v1368_v47, %v1369_v5 }
 0x565   :  { %v1371_v26 = vmax.f32 %v1370_v28, 0.0 }
 0x567   :  { %v1372_v57 = vadd.f32 1e-05, %v1371_v26 }
 0x569   :  { %2131 = vrsqrt.f32 %v1372_v57 }
 0x576   :  { %v2132_v13 = vpop.eup %2131 }
 0x577   :  { %v1374_v56 = vmul.f32 %v2132_v13, %v1155_v48 }
 0x579   :  { %v1375_v37 = vmul.f32 %v1374_v56, %v1367_v27  ;;  %v1383_v39 = vrot.slane %v1374_v56, %v2504_v1 }
 0x57b   :  { %v1377_v15 = vrot.slane %v1375_v37, 7  ;;  %v1397_v42 = vmul.f32 %v1383_v39, %v1297_v3  ;;  %v1384_v20 = vmul.f32 %v1383_v39, %v2757_v8  ;;  %v1385_v22 = vmul.f32 %v1383_v39, %v2761_v23 }
 0x57c   :  { %v1388_v46 = vmul.f32 %v1383_v39, %v2774_v31  ;;  %v1389_v59 = vmul.f32 %v1383_v39, %v2784_v38  ;;  %v1386_v2 = vmul.f32 %v2755_v19, %v1383_v39  ;;  %v1387_v3 = vmul.f32 %v2759_v12, %v1383_v39 }
 0x57d   :  { %v1379_v24 = vsub.f32 %v1155_v48, %v1377_v15  ;;  %v1390_v8 = vmul.f32 %v2769_v33, %v1383_v39  ;;  %v1391_v31 = vmul.f32 %v2779_v62, %v1383_v39  ;;  %v1392_v17 = vmul.f32 %v1383_v39, %v2794_v61  ;;  %v1688_v48 = vld [vmem:[%s2868_s12] ss:$0 sm:$0xff]  ;;  %s2256_s12 = smov [#allocation8]  }
 0x57e   :  { %v1393_v19 = vmul.f32 %v1383_v39, %v2804_v41  ;;  %v1394_v12 = vmul.f32 %v2789_v7, %v1383_v39  ;;  %v1395_v33 = vmul.f32 %v2799_v0, %v1383_v39  ;;  %v1396_v62 = vmul.f32 %v1383_v39, %v2814_v49  ;;  %s1633_s29 = sshll.u32 %s2256_s12, 4  ;;  %s1634_s29 = int_to_ptr.vmem [resolvable:$true] %s1633_s29 }
 0x57f   :  { %v1403_v45 = vrot.slane %v1379_v24, %v2507_v6  ;;  %v1398_v61 = vmul.f32 %v2809_v25, %v1383_v39  ;;  %v1399_v41 = vmul.f32 %v2819_v58, %v1383_v39  ;;  %s2225_s3 = scalar_lea.vmem %s1634_s29, 2048  ;;  %p2230_p2 = scmp.lt.s32.totalorder %s1634_s29, %s1634_s29 }
 0x580   :  { %p2226_p1 = scmp.ne.s32.totalorder %s1634_s29, %s2225_s3  ;;  %p2231_p3 = scmp.lt.s32.totalorder %s2225_s3, %s2225_s3 }
 0x581   :  { %v1417_v50 = vadd.f32 %v1403_v45, %v1397_v42  ;;  %v1404_v53 = vadd.f32 %v1403_v45, %v1384_v20  ;;  %v1405_v55 = vadd.f32 %v1403_v45, %v1385_v22  ;;  %v1408_v63 = vadd.f32 %v1403_v45, %v1388_v46 }
 0x582   :  { %v1409_v1 = vadd.f32 %v1403_v45, %v1389_v59  ;;  %v1406_v6 = vadd.f32 %v1403_v45, %v1386_v2  ;;  %v1407_v23 = vadd.f32 %v1403_v45, %v1387_v3  ;;  %v1410_v9 = vadd.f32 %v1403_v45, %v1390_v8  ;;  %p2232_p4 = por %p2231_p3, %p2230_p2 }
 0x583   :  { %2133 = vtanh.f32 %v1417_v50  ;;  %v1411_v38 = vadd.f32 %v1403_v45, %v1391_v31  ;;  %v1412_v21 = vadd.f32 %v1403_v45, %v1392_v17  ;;  %v1413_v10 = vadd.f32 %v1403_v45, %v1393_v19 }
 0x584   :  { %2135 = vtanh.f32 %v1404_v53  ;;  %v1414_v18 = vadd.f32 %v1403_v45, %v1394_v12  ;;  %v1415_v11 = vadd.f32 %v1403_v45, %v1395_v33  ;;  %v1416_v30 = vadd.f32 %v1403_v45, %v1396_v62  ;;  %p2233_p5 = pnand %p2232_p4, %p2226_p1 }
 0x585   :  { %2137 = vtanh.f32 %v1405_v55  ;;  %v1418_v14 = vadd.f32 %v1403_v45, %v1398_v61  ;;  %v1419_v7 = vadd.f32 %v1403_v45, %v1399_v41 }
 0x586   :  { %2139 = vtanh.f32 %v1408_v63 }
 0x587   :  { %2141 = vtanh.f32 %v1409_v1 }
 0x588   :  { %2143 = vtanh.f32 %v1406_v6 }
 0x589   :  { %2145 = vtanh.f32 %v1407_v23 }
 0x58a   :  { %2147 = vtanh.f32 %v1410_v9 }
 0x58b   :  { %2149 = vtanh.f32 %v1411_v38 }
 0x58c   :  { %2151 = vtanh.f32 %v1412_v21 }
 0x58d   :  { %2153 = vtanh.f32 %v1413_v10 }
 0x58e   :  { %2155 = vtanh.f32 %v1414_v18 }
 0x58f   :  { %2157 = vtanh.f32 %v1415_v11 }
 0x590   :  { %v2134_v34 = vpop.eup %2133  ;;  %2159 = vtanh.f32 %v1416_v30 }
 0x591   :  { %v2136_v0 = vpop.eup %2135  ;;  %2161 = vtanh.f32 %v1418_v14 }
 0x592   :  { %v2138_v40 = vpop.eup %2137  ;;  %2163 = vtanh.f32 %v1419_v7 }
 0x593   :  { %v2140_v49 = vpop.eup %2139  ;;  %v1453_v32 = vpack.c.bf16 %v2138_v40, %v2136_v0 }
 0x594   :  { %v2142_v43 = vpop.eup %2141 }
 0x595   :  { %v2144_v36 = vpop.eup %2143  ;;  %1948 = vmatprep.mubr.bf16.mxu0 %v1453_v32  ;;  %v1455_v25 = vpack.c.bf16 %v2142_v43, %v2140_v49 }
 0x596   :  { %v2146_v51 = vpop.eup %2145 }
 0x597   :  { %v2148_v35 = vpop.eup %2147  ;;  %1952 = vmatprep.mubr.bf16.mxu1 %v1455_v25  ;;  %v1454_v58 = vpack.c.bf16 %v2146_v51, %v2144_v36 }
 0x598   :  { %v2150_v60 = vpop.eup %2149 }
 0x599   :  { %v2152_v29 = vpop.eup %2151  ;;  %1949 = vmatmul.mubr.bf16.vlgmr.msra.gmra.mxu0 %v1454_v58  ;;  %v1456_v44 = vpack.c.bf16 %v2150_v60, %v2148_v35 }
 0x59a   :  { %v2154_v4 = vpop.eup %2153 }
 0x59b   :  { %v2156_v16 = vpop.eup %2155  ;;  %1953 = vmatmul.mubr.bf16.vlgmr.msra.gmra.mxu1 %v1456_v44  ;;  %v1457_v54 = vpack.c.bf16 %v2154_v4, %v2152_v29 }
 0x59c   :  { %v2158_v52 = vpop.eup %2157 }
 0x59d   :  { %v2160_v27 = vpop.eup %2159  ;;  %1956 = vmatprep.mubr.bf16.mxu1 %v1457_v54  ;;  %v1458_v47 = vpack.c.bf16 %v2158_v52, %v2156_v16 }
 0x59e   :  { %v2162_v5 = vpop.eup %2161  ;;  %v1459_v57 = vpack.c.bf16 %v2134_v34, %v2160_v27 }
 0x59f   :  { %v2164_v28 = vpop.eup %2163 }
 0x5a0   :  { %v1460_v26 = vpack.c.bf16 %v2164_v28, %v2162_v5 }
 0x5a3   :  { %1957 = vmatmul.mubr.bf16.gmra.mxu1 %v1458_v47 }
 0x5a4   :  { %1960 = vmatprep.mubr.bf16.mxu1 %v1459_v57 }
 0x5ab   :  { %1961 = vmatmul.mubr.bf16.gmra.mxu1 %v1460_v26 }
 0x659   :  { %v1950_v13 = vpop.f32.mrf.mxu0 }
 0x65a   :  { %v1558_v56 = vadd.f32 %v1950_v13, %v1688_v48 }
 0x65b   :  { %v1954_v37 = vpop.f32.mrf.mxu1  ;;  %v1549_v15 = vpop.f32.mrf.mxu0 }
 0x65c   :  { %1614 = vst [vmem:[#allocation8 + $0x10] sm:$0xff] %v1558_v56  ;;  %v1574_v39 = vadd.f32 %v1954_v37, %v1688_v48  ;;  %v1550_v24 = vadd.f32 %v1688_v48, %v1549_v15 }
 0x65d   :  { %v1565_v42 = vpop.f32.mrf.mxu1  ;;  %v1951_v45 = vpop.f32.mrf.mxu0 }
 0x65e   :  { %1618 = vst [vmem:[#allocation8 + $0x30] sm:$0xff] %v1574_v39  ;;  %1612 = vst [vmem:[#allocation8] sm:$0xff] %v1550_v24  ;;  %v1566_v20 = vadd.f32 %v1688_v48, %v1565_v42  ;;  %v1561_v22 = vadd.f32 %v1951_v45, %v1688_v48 }
 0x65f   :  { %v1955_v46 = vpop.f32.mrf.mxu1  ;;  %v1552_v50 = vpop.f32.mrf.mxu0 }
 0x660   :  { %1616 = vst [vmem:[#allocation8 + $0x20] sm:$0xff] %v1566_v20  ;;  %1615 = vst [vmem:[#allocation8 + $0x18] sm:$0xff] %v1561_v22  ;;  %v1577_v53 = vadd.f32 %v1955_v46, %v1688_v48  ;;  %v1553_v55 = vadd.f32 %v1688_v48, %v1552_v50 }
 0x661   :  { %v1568_v59 = vpop.f32.mrf.mxu1 }
 0x662   :  { %1619 = vst [vmem:[#allocation8 + $0x38] sm:$0xff] %v1577_v53  ;;  %1613 = vst [vmem:[#allocation8 + $0x8] sm:$0xff] %v1553_v55  ;;  %v1569_v63 = vadd.f32 %v1688_v48, %v1568_v59 }
 0x663   :  { %v1958_v2 = vpop.f32.mrf.mxu1 }
 0x664   :  { %1617 = vst [vmem:[#allocation8 + $0x28] sm:$0xff] %v1569_v63  ;;  %v1590_v1 = vadd.f32 %v1958_v2, %v1688_v48 }
 0x665   :  { %v1581_v3 = vpop.f32.mrf.mxu1 }
 0x666   :  { %1622 = vst [vmem:[#allocation8 + $0x50] sm:$0xff] %v1590_v1  ;;  %v1582_v6 = vadd.f32 %v1688_v48, %v1581_v3 }
 0x667   :  { %v1959_v8 = vpop.f32.mrf.mxu1 }
 0x668   :  { %1620 = vst [vmem:[#allocation8 + $0x40] sm:$0xff] %v1582_v6  ;;  %v1593_v23 = vadd.f32 %v1959_v8, %v1688_v48 }
 0x669   :  { %v1584_v31 = vpop.f32.mrf.mxu1 }
 0x66a   :  { %1623 = vst [vmem:[#allocation8 + $0x58] sm:$0xff] %v1593_v23  ;;  %v1585_v9 = vadd.f32 %v1688_v48, %v1584_v31 }
 0x66b   :  { %v1962_v17 = vpop.f32.mrf.mxu1 }
 0x66c   :  { %1621 = vst [vmem:[#allocation8 + $0x48] sm:$0xff] %v1585_v9  ;;  %v1606_v38 = vadd.f32 %v1962_v17, %v1688_v48 }
 0x66d   :  { %v1597_v19 = vpop.f32.mrf.mxu1 }
 0x66e   :  { %1626 = vst [vmem:[#allocation8 + $0x70] sm:$0xff] %v1606_v38  ;;  %v1598_v21 = vadd.f32 %v1688_v48, %v1597_v19 }
 0x66f   :  { %v1963_v12 = vpop.f32.mrf.mxu1 }
 0x670   :  { %1624 = vst [vmem:[#allocation8 + $0x60] sm:$0xff] %v1598_v21  ;;  %v1609_v10 = vadd.f32 %v1963_v12, %v1688_v48 }
 0x671   :  { %v1600_v33 = vpop.f32.mrf.mxu1 }
 0x672   :  { %1627 = vst [vmem:[#allocation8 + $0x78] sm:$0xff] %v1609_v10  ;;  %v1601_v18 = vadd.f32 %v1688_v48, %v1600_v33 }
 0x674   :  { %1625 = vst [vmem:[#allocation8 + $0x68] sm:$0xff] %v1601_v18 }
 0x675   :  { %2236 = shalt.err (!%p2233_p5)
}
 0x676   :  { %s2257_s15 = smov 128   ;;  %s2258_s2 = smov 8  }
 0x677   :  { %1639 = dma.vmem_to_hbm [thread:$0]  %s1634_s29, 2048, %s2869_s13, [#allocation4], %s2257_s15, %s2257_s15, %s2258_s2  }
 0x678   :  { %2249 = dma.done.wait [#allocation4], 2048  }
 0x679   :  { %2250 = vsyncadd [#allocation4], 4294965248 }
 0x67a   :  { %1643 = vsyncpa [#allocation3], 1 }
 0x67b   :  { %1644 = vsyncpa [#allocation6], 1 }
 0x67c   :  { %1645 = vsyncpa [#allocation4], 1 }

</bundles_post_ra>
